<compile_context>
chip_gen: v7x
topology: tpu7x:2x2x1
jax: 0.10.0
libtpu: 0.0.40
codegen_flags: <defaults>
</compile_context>

<pallas_src>
import functools
import math

import jax
import jax.numpy as jnp
from jax.experimental import pallas as pl
from jax.experimental.pallas import tpu as pltpu


# ----------------------------------------------------------------------------
# Kernel 1: batched embedding row-gather (scalar-prefetched ids, manual DMA).
# Per grid step: start G row DMAs (all in flight before any wait) from the HBM
# weight into a (G, E) VMEM scratch, wait, then one dense (G, E) output store.
# padding_idx semantics come for free: that weight row is zero.
# ----------------------------------------------------------------------------
def _embed_gather_kernel(ids_ref, w_hbm, out_ref, rows, sems, *, rows_per_step):
    base = pl.program_id(0) * rows_per_step
    copies = []
    for j in range(rows_per_step):           # static unroll, all DMAs in flight
        idx = ids_ref[base + j]
        cp = pltpu.make_async_copy(
            w_hbm.at[pl.ds(idx, 1)], rows.at[pl.ds(j, 1)], sems.at[j])
        cp.start()
        copies.append(cp)
    for cp in copies:
        cp.wait()
    out_ref[...] = rows[...]


def embedding_lookup(tgt_sents, weight, rows_per_step=16):
    B, T = tgt_sents.shape
    V, E = weight.shape
    BT = B * T

    # rows fetched per grid step: multiple of 8 (fills output sublanes) when possible
    G = min(rows_per_step, BT)
    if G >= 8:
        G = (G // 8) * 8
    BT_pad = -(-BT // G) * G

    ids = tgt_sents.reshape(BT).astype(jnp.int32)
    if BT_pad != BT:
        ids = jnp.pad(ids, (0, BT_pad - BT))     # pad with a valid index (0)

    kernel = functools.partial(_embed_gather_kernel, rows_per_step=G)

    out = pl.pallas_call(
        kernel,
        out_shape=jax.ShapeDtypeStruct((BT_pad, E), weight.dtype),
        grid_spec=pltpu.PrefetchScalarGridSpec(
            num_scalar_prefetch=1,
            grid=(BT_pad // G,),
            in_specs=[pl.BlockSpec(memory_space=pl.ANY)],          # weight in HBM
            out_specs=pl.BlockSpec((G, E), lambda i, ids_ref: (i, 0)),
            scratch_shapes=[
                pltpu.VMEM((G, E), weight.dtype),
                pltpu.SemaphoreType.DMA((G,)),
            ],
        ),
        compiler_params=pltpu.CompilerParams(
            dimension_semantics=("parallel",)),   # independent steps; shards on v7x
    )(ids, weight)
    return out[:BT].reshape(B, T, E)


# ----------------------------------------------------------------------------
# Kernel 2: fused reparameterize + log_probability, tiled over TB batch rows.
# Per grid step (block shapes):
#   mu, logvar, mask : [TB, T*NZ]   (lane-dense, mask pre-broadcast over NZ)
#   cc               : [TB, 1]      (mask.sum*NZ*log(2pi) + sum(logvar), hoisted)
#   eps              : [TB, N, T*NZ]
# Outputs:
#   z  (+ optional eps_masked) : [TB, N, T*NZ]
#   log_probs                  : [TB, N]
# Math (matches the PyTorch reference exactly, incl. unmasked logvar term):
#   std        = exp(0.5 * logvar)
#   eps_masked = eps * mask
#   z          = eps_masked * std + mu
#   log_probs  = -0.5 * ( sum(eps_masked^2) + cc )   with cc already containing
#                sum(logvar) + mask.sum * NZ * log(2*pi)
# ----------------------------------------------------------------------------
def _reparam_body(mu_ref, lv_ref, mask_ref, cc_ref, eps_ref,
                  z_ref, logp_ref, eps_out_ref):
    mu = mu_ref[...]            # [TB, TNZ]
    lv = lv_ref[...]            # [TB, TNZ]
    mask = mask_ref[...]        # [TB, TNZ]
    eps = eps_ref[...]          # [TB, N, TNZ]

    std = jnp.exp(lv * 0.5)                              # [TB, TNZ]
    eps_m = eps * mask[:, None, :]                       # [TB, N, TNZ]
    z = eps_m * std[:, None, :] + mu[:, None, :]         # [TB, N, TNZ]

    z_ref[...] = z.astype(z_ref.dtype)
    if eps_out_ref is not None:
        eps_out_ref[...] = eps_m.astype(eps_out_ref.dtype)

    sq = jnp.sum(eps_m * eps_m, axis=2)                  # [TB, N]
    logp_ref[...] = ((sq + cc_ref[...]) * -0.5).astype(logp_ref.dtype)


def _reparam_kernel_with_eps(mu_ref, lv_ref, mask_ref, cc_ref, eps_ref,
                             z_ref, eps_out_ref, logp_ref):
    _reparam_body(mu_ref, lv_ref, mask_ref, cc_ref, eps_ref,
                  z_ref, logp_ref, eps_out_ref)


def _reparam_kernel_no_eps(mu_ref, lv_ref, mask_ref, cc_ref, eps_ref,
                           z_ref, logp_ref):
    _reparam_body(mu_ref, lv_ref, mask_ref, cc_ref, eps_ref,
                  z_ref, logp_ref, None)


def reparameterize_and_logprob(mu, logvar, mask, eps, *, return_eps=False,
                               z_dtype=None, vmem_block_budget=24 << 20):
    """Returns (z, log_probs) or (z, eps_masked, log_probs) if return_eps."""
    B, T, NZ = mu.shape
    N = eps.shape[1]
    TNZ = T * NZ
    z_dtype = z_dtype or mu.dtype

    # Wrapper-side layout plumbing (lane-dense last dim, hoisted reductions).
    mu_f = mu.reshape(B, TNZ)
    lv_f = logvar.reshape(B, TNZ)
    mask_f = jnp.broadcast_to(mask[:, :, None], (B, T, NZ)).reshape(B, TNZ)
    mask_f = mask_f.astype(mu.dtype)
    cc = (jnp.sum(mask, axis=1, keepdims=True) * (math.log(math.pi * 2.0) * NZ)
          + jnp.sum(lv_f.astype(jnp.float32), axis=1, keepdims=True))
    cc = cc.astype(jnp.float32)                           # [B, 1]
    eps_f = eps.reshape(B, N, TNZ)

    # Batch-tile size: multiple of 8 sublanes, sized to keep double-buffered
    # live block bytes under the budget (fits the default scoped VMEM on
    # v5e/v6e/v7x; explicit vmem_limit_bytes below gives extra headroom).
    n_big_out = 2 if return_eps else 1
    row_bytes = 4 * (3 * TNZ + 1 + (1 + n_big_out) * N * TNZ + N)
    if B <= 8:
        TB = B
    else:
        tb_cap = max(8, (vmem_block_budget // (2 * row_bytes)) // 8 * 8)
        TB = max(8, min(tb_cap, (B // 8) * 8))
    B_pad = -(-B // TB) * TB
    if B_pad != B:
        pad = B_pad - B
        pad_rows = lambda x: jnp.pad(x, ((0, pad),) + ((0, 0),) * (x.ndim - 1))
        mu_f, lv_f, mask_f, cc, eps_f = (
            pad_rows(a) for a in (mu_f, lv_f, mask_f, cc, eps_f))

    in_specs = [
        pl.BlockSpec((TB, TNZ), lambda b: (b, 0)),        # mu
        pl.BlockSpec((TB, TNZ), lambda b: (b, 0)),        # logvar
        pl.BlockSpec((TB, TNZ), lambda b: (b, 0)),        # mask (broadcast)
        pl.BlockSpec((TB, 1), lambda b: (b, 0)),          # cc (+ sum logvar)
        pl.BlockSpec((TB, N, TNZ), lambda b: (b, 0, 0)),  # eps
    ]
    out_shapes = [jax.ShapeDtypeStruct((B_pad, N, TNZ), z_dtype)]
    out_specs = [pl.BlockSpec((TB, N, TNZ), lambda b: (b, 0, 0))]
    if return_eps:
        out_shapes.append(jax.ShapeDtypeStruct((B_pad, N, TNZ), z_dtype))
        out_specs.append(pl.BlockSpec((TB, N, TNZ), lambda b: (b, 0, 0)))
    out_shapes.append(jax.ShapeDtypeStruct((B_pad, N), jnp.float32))
    out_specs.append(pl.BlockSpec((TB, N), lambda b: (b, 0)))

    kernel = _reparam_kernel_with_eps if return_eps else _reparam_kernel_no_eps

    outs = pl.pallas_call(
        kernel,
        out_shape=tuple(out_shapes),
        grid=(B_pad // TB,),
        in_specs=in_specs,
        out_specs=tuple(out_specs),
        compiler_params=pltpu.CompilerParams(
            dimension_semantics=("parallel",),
            vmem_limit_bytes=48 * 1024 * 1024),
    )(mu_f, lv_f, mask_f, cc, eps_f)

    z = outs[0][:B].reshape(B, N, T, NZ)
    logp = outs[-1][:B]
    if return_eps:
        eps_m = outs[1][:B].reshape(B, N, T, NZ)
        return z, eps_m, logp
    return z, logp


# ----------------------------------------------------------------------------
# Pure-JAX reference (mirrors the PyTorch static methods exactly)
# ----------------------------------------------------------------------------
def ref_reparam_logprob(mu, logvar, mask, eps):
    B, T, NZ = mu.shape
    std = jnp.exp(0.5 * logvar)
    eps_m = eps * mask[:, None, :, None]
    z = eps_m * std[:, None] + mu[:, None]
    lp = logvar[:, None] + eps_m ** 2
    cc = jnp.sum(mask, axis=1, keepdims=True) * (math.log(math.pi * 2.0) * NZ)
    lp = lp.reshape(B, eps.shape[1], -1).sum(axis=2) + cc
    return z, eps_m, lp * -0.5


if __name__ == "__main__":
    B, T, NZ, N = 2, 8, 32, 2
    V, E, PAD = 16, 32, 0

    key = jax.random.PRNGKey(0)
    k_w, k_ids, k_mu, k_lv, k_eps = jax.random.split(key, 5)

    # Embedding weight: uniform(-0.1, 0.1), padding row zeroed (reset_parameters)
    weight = jax.random.uniform(k_w, (V, E), jnp.float32, minval=-0.1, maxval=0.1)
    weight = weight.at[PAD].set(0.0)

    # Target sentences with trailing padding
    tgt_sents = jax.random.randint(k_ids, (B, T), 1, V).astype(jnp.int32)
    tgt_sents = tgt_sents.at[0, T - 2:].set(PAD).at[1, T - 3:].set(PAD)
    tgt_masks = (tgt_sents != PAD).astype(jnp.float32)

    # mu / logvar (produced by the abstract posterior network in subclasses)
    mu = jax.random.normal(k_mu, (B, T, NZ), jnp.float32)
    logvar = 0.1 * jax.random.normal(k_lv, (B, T, NZ), jnp.float32)
    eps = jax.random.normal(k_eps, (B, N, T, NZ), jnp.float32)

    # --- kernel 1: batched embedding gather ---
    emb = jax.block_until_ready(embedding_lookup(tgt_sents, weight))
    emb_ref = weight[tgt_sents]
    assert emb.shape == (B, T, E)
    assert jnp.allclose(emb, emb_ref, atol=1e-6), "embedding mismatch"

    z_r, eps_r, logp_r = ref_reparam_logprob(mu, logvar, tgt_masks, eps)

    # --- kernel 2 (primary, write-light path): z + log_probs only ---
    z, logp = reparameterize_and_logprob(mu, logvar, tgt_masks, eps,
                                         return_eps=False)
    z = jax.block_until_ready(z)
    logp = jax.block_until_ready(logp)
    assert z.shape == (B, N, T, NZ) and logp.shape == (B, N)
    assert jnp.allclose(z, z_r, atol=1e-4), "z mismatch"
    assert jnp.allclose(logp, logp_r, atol=1e-3, rtol=1e-4), "log_prob mismatch"

    # --- kernel 2 (full reparameterize() contract: also return masked eps) ---
    z2, eps_m, logp2 = reparameterize_and_logprob(mu, logvar, tgt_masks, eps,
                                                  return_eps=True)
    jax.block_until_ready((z2, eps_m, logp2))
    assert jnp.allclose(z2, z_r, atol=1e-4), "z mismatch (return_eps)"
    assert jnp.allclose(eps_m, eps_r, atol=1e-5), "eps mismatch"
    assert jnp.allclose(logp2, logp_r, atol=1e-3, rtol=1e-4), "log_prob mismatch (return_eps)"

    print("KERNEL_OK")
</pallas_src>

<mosaic_0001>
module attributes {stable_mosaic.version = 11 : i64} {
  func.func @_embed_gather_kernel(%arg0: i32, %arg1: memref<16xi32, #tpu.memory_space<smem>>, %arg2: memref<16x32xf32, #tpu.memory_space<any>>, %arg3: memref<16x32xf32, #tpu.memory_space<vmem>>, %arg4: memref<16x32xf32, #tpu.memory_space<vmem>>, %arg5: memref<16x!tpu.dma_semaphore, #tpu.memory_space<semaphore_mem>>) attributes {dimension_semantics = [#tpu.dimension_semantics<parallel>], iteration_bounds = array<i64: 1>, scalar_prefetch = 1 : i64, scratch_operands = 2 : i64, tpu.core_type = #tpu.core_type<tc>, window_params = [{}, {transform_indices = @transform_1, window_bounds = array<i64: 16, 32>}]} {
    %c16_i32 = arith.constant 16 : i32
    %0 = arith.muli %arg0, %c16_i32 : i32
    %c0_i32 = arith.constant 0 : i32
    %1 = arith.addi %0, %c0_i32 : i32
    %2 = arith.index_cast %1 : i32 to index
    %3 = memref.load %arg1[%2] : memref<16xi32, #tpu.memory_space<smem>>
    %c0_i32_0 = arith.constant 0 : i32
    %c0_i32_1 = arith.constant 0 : i32
    %4 = tpu.memref_slice %arg2[%3, %c0_i32_1] : memref<16x32xf32, #tpu.memory_space<any>> -> memref<1x32xf32, #tpu.memory_space<any>>
    %c0_i32_2 = arith.constant 0 : i32
    %c0_i32_3 = arith.constant 0 : i32
    %5 = tpu.memref_slice %arg4[%c0_i32_2, %c0_i32_3] : memref<16x32xf32, #tpu.memory_space<vmem>> -> memref<1x32xf32, #tpu.memory_space<vmem>>
    %6 = tpu.memref_slice %arg5[%c0_i32_0] : memref<16x!tpu.dma_semaphore, #tpu.memory_space<semaphore_mem>> -> memref<1x!tpu.dma_semaphore, #tpu.memory_space<semaphore_mem>>
    %7 = tpu.memref_squeeze %6 : memref<1x!tpu.dma_semaphore, #tpu.memory_space<semaphore_mem>> -> memref<!tpu.dma_semaphore, #tpu.memory_space<semaphore_mem>>
    tpu.enqueue_dma source(%4 : memref<1x32xf32, #tpu.memory_space<any>>) target(%5 : memref<1x32xf32, #tpu.memory_space<vmem>>) target_semaphore(%7 : memref<!tpu.dma_semaphore, #tpu.memory_space<semaphore_mem>>)
    %c1_i32 = arith.constant 1 : i32
    %8 = arith.addi %0, %c1_i32 : i32
    %9 = arith.index_cast %8 : i32 to index
    %10 = memref.load %arg1[%9] : memref<16xi32, #tpu.memory_space<smem>>
    %c1_i32_4 = arith.constant 1 : i32
    %c0_i32_5 = arith.constant 0 : i32
    %11 = tpu.memref_slice %arg2[%10, %c0_i32_5] : memref<16x32xf32, #tpu.memory_space<any>> -> memref<1x32xf32, #tpu.memory_space<any>>
    %c1_i32_6 = arith.constant 1 : i32
    %c0_i32_7 = arith.constant 0 : i32
    %12 = tpu.memref_slice %arg4[%c1_i32_6, %c0_i32_7] : memref<16x32xf32, #tpu.memory_space<vmem>> -> memref<1x32xf32, #tpu.memory_space<vmem>>
    %13 = tpu.memref_slice %arg5[%c1_i32_4] : memref<16x!tpu.dma_semaphore, #tpu.memory_space<semaphore_mem>> -> memref<1x!tpu.dma_semaphore, #tpu.memory_space<semaphore_mem>>
    %14 = tpu.memref_squeeze %13 : memref<1x!tpu.dma_semaphore, #tpu.memory_space<semaphore_mem>> -> memref<!tpu.dma_semaphore, #tpu.memory_space<semaphore_mem>>
    tpu.enqueue_dma source(%11 : memref<1x32xf32, #tpu.memory_space<any>>) target(%12 : memref<1x32xf32, #tpu.memory_space<vmem>>) target_semaphore(%14 : memref<!tpu.dma_semaphore, #tpu.memory_space<semaphore_mem>>)
    %c2_i32 = arith.constant 2 : i32
    %15 = arith.addi %0, %c2_i32 : i32
    %16 = arith.index_cast %15 : i32 to index
    %17 = memref.load %arg1[%16] : memref<16xi32, #tpu.memory_space<smem>>
    %c2_i32_8 = arith.constant 2 : i32
    %c0_i32_9 = arith.constant 0 : i32
    %18 = tpu.memref_slice %arg2[%17, %c0_i32_9] : memref<16x32xf32, #tpu.memory_space<any>> -> memref<1x32xf32, #tpu.memory_space<any>>
    %c2_i32_10 = arith.constant 2 : i32
    %c0_i32_11 = arith.constant 0 : i32
    %19 = tpu.memref_slice %arg4[%c2_i32_10, %c0_i32_11] : memref<16x32xf32, #tpu.memory_space<vmem>> -> memref<1x32xf32, #tpu.memory_space<vmem>>
    %20 = tpu.memref_slice %arg5[%c2_i32_8] : memref<16x!tpu.dma_semaphore, #tpu.memory_space<semaphore_mem>> -> memref<1x!tpu.dma_semaphore, #tpu.memory_space<semaphore_mem>>
    %21 = tpu.memref_squeeze %20 : memref<1x!tpu.dma_semaphore, #tpu.memory_space<semaphore_mem>> -> memref<!tpu.dma_semaphore, #tpu.memory_space<semaphore_mem>>
    tpu.enqueue_dma source(%18 : memref<1x32xf32, #tpu.memory_space<any>>) target(%19 : memref<1x32xf32, #tpu.memory_space<vmem>>) target_semaphore(%21 : memref<!tpu.dma_semaphore, #tpu.memory_space<semaphore_mem>>)
    %c3_i32 = arith.constant 3 : i32
    %22 = arith.addi %0, %c3_i32 : i32
    %23 = arith.index_cast %22 : i32 to index
    %24 = memref.load %arg1[%23] : memref<16xi32, #tpu.memory_space<smem>>
    %c3_i32_12 = arith.constant 3 : i32
    %c0_i32_13 = arith.constant 0 : i32
    %25 = tpu.memref_slice %arg2[%24, %c0_i32_13] : memref<16x32xf32, #tpu.memory_space<any>> -> memref<1x32xf32, #tpu.memory_space<any>>
    %c3_i32_14 = arith.constant 3 : i32
    %c0_i32_15 = arith.constant 0 : i32
    %26 = tpu.memref_slice %arg4[%c3_i32_14, %c0_i32_15] : memref<16x32xf32, #tpu.memory_space<vmem>> -> memref<1x32xf32, #tpu.memory_space<vmem>>
    %27 = tpu.memref_slice %arg5[%c3_i32_12] : memref<16x!tpu.dma_semaphore, #tpu.memory_space<semaphore_mem>> -> memref<1x!tpu.dma_semaphore, #tpu.memory_space<semaphore_mem>>
    %28 = tpu.memref_squeeze %27 : memref<1x!tpu.dma_semaphore, #tpu.memory_space<semaphore_mem>> -> memref<!tpu.dma_semaphore, #tpu.memory_space<semaphore_mem>>
    tpu.enqueue_dma source(%25 : memref<1x32xf32, #tpu.memory_space<any>>) target(%26 : memref<1x32xf32, #tpu.memory_space<vmem>>) target_semaphore(%28 : memref<!tpu.dma_semaphore, #tpu.memory_space<semaphore_mem>>)
    %c4_i32 = arith.constant 4 : i32
    %29 = arith.addi %0, %c4_i32 : i32
    %30 = arith.index_cast %29 : i32 to index
    %31 = memref.load %arg1[%30] : memref<16xi32, #tpu.memory_space<smem>>
    %c4_i32_16 = arith.constant 4 : i32
    %c0_i32_17 = arith.constant 0 : i32
    %32 = tpu.memref_slice %arg2[%31, %c0_i32_17] : memref<16x32xf32, #tpu.memory_space<any>> -> memref<1x32xf32, #tpu.memory_space<any>>
    %c4_i32_18 = arith.constant 4 : i32
    %c0_i32_19 = arith.constant 0 : i32
    %33 = tpu.memref_slice %arg4[%c4_i32_18, %c0_i32_19] : memref<16x32xf32, #tpu.memory_space<vmem>> -> memref<1x32xf32, #tpu.memory_space<vmem>>
    %34 = tpu.memref_slice %arg5[%c4_i32_16] : memref<16x!tpu.dma_semaphore, #tpu.memory_space<semaphore_mem>> -> memref<1x!tpu.dma_semaphore, #tpu.memory_space<semaphore_mem>>
    %35 = tpu.memref_squeeze %34 : memref<1x!tpu.dma_semaphore, #tpu.memory_space<semaphore_mem>> -> memref<!tpu.dma_semaphore, #tpu.memory_space<semaphore_mem>>
    tpu.enqueue_dma source(%32 : memref<1x32xf32, #tpu.memory_space<any>>) target(%33 : memref<1x32xf32, #tpu.memory_space<vmem>>) target_semaphore(%35 : memref<!tpu.dma_semaphore, #tpu.memory_space<semaphore_mem>>)
    %c5_i32 = arith.constant 5 : i32
    %36 = arith.addi %0, %c5_i32 : i32
    %37 = arith.index_cast %36 : i32 to index
    %38 = memref.load %arg1[%37] : memref<16xi32, #tpu.memory_space<smem>>
    %c5_i32_20 = arith.constant 5 : i32
    %c0_i32_21 = arith.constant 0 : i32
    %39 = tpu.memref_slice %arg2[%38, %c0_i32_21] : memref<16x32xf32, #tpu.memory_space<any>> -> memref<1x32xf32, #tpu.memory_space<any>>
    %c5_i32_22 = arith.constant 5 : i32
    %c0_i32_23 = arith.constant 0 : i32
    %40 = tpu.memref_slice %arg4[%c5_i32_22, %c0_i32_23] : memref<16x32xf32, #tpu.memory_space<vmem>> -> memref<1x32xf32, #tpu.memory_space<vmem>>
    %41 = tpu.memref_slice %arg5[%c5_i32_20] : memref<16x!tpu.dma_semaphore, #tpu.memory_space<semaphore_mem>> -> memref<1x!tpu.dma_semaphore, #tpu.memory_space<semaphore_mem>>
    %42 = tpu.memref_squeeze %41 : memref<1x!tpu.dma_semaphore, #tpu.memory_space<semaphore_mem>> -> memref<!tpu.dma_semaphore, #tpu.memory_space<semaphore_mem>>
    tpu.enqueue_dma source(%39 : memref<1x32xf32, #tpu.memory_space<any>>) target(%40 : memref<1x32xf32, #tpu.memory_space<vmem>>) target_semaphore(%42 : memref<!tpu.dma_semaphore, #tpu.memory_space<semaphore_mem>>)
    %c6_i32 = arith.constant 6 : i32
    %43 = arith.addi %0, %c6_i32 : i32
    %44 = arith.index_cast %43 : i32 to index
    %45 = memref.load %arg1[%44] : memref<16xi32, #tpu.memory_space<smem>>
    %c6_i32_24 = arith.constant 6 : i32
    %c0_i32_25 = arith.constant 0 : i32
    %46 = tpu.memref_slice %arg2[%45, %c0_i32_25] : memref<16x32xf32, #tpu.memory_space<any>> -> memref<1x32xf32, #tpu.memory_space<any>>
    %c6_i32_26 = arith.constant 6 : i32
    %c0_i32_27 = arith.constant 0 : i32
    %47 = tpu.memref_slice %arg4[%c6_i32_26, %c0_i32_27] : memref<16x32xf32, #tpu.memory_space<vmem>> -> memref<1x32xf32, #tpu.memory_space<vmem>>
    %48 = tpu.memref_slice %arg5[%c6_i32_24] : memref<16x!tpu.dma_semaphore, #tpu.memory_space<semaphore_mem>> -> memref<1x!tpu.dma_semaphore, #tpu.memory_space<semaphore_mem>>
    %49 = tpu.memref_squeeze %48 : memref<1x!tpu.dma_semaphore, #tpu.memory_space<semaphore_mem>> -> memref<!tpu.dma_semaphore, #tpu.memory_space<semaphore_mem>>
    tpu.enqueue_dma source(%46 : memref<1x32xf32, #tpu.memory_space<any>>) target(%47 : memref<1x32xf32, #tpu.memory_space<vmem>>) target_semaphore(%49 : memref<!tpu.dma_semaphore, #tpu.memory_space<semaphore_mem>>)
    %c7_i32 = arith.constant 7 : i32
    %50 = arith.addi %0, %c7_i32 : i32
    %51 = arith.index_cast %50 : i32 to index
    %52 = memref.load %arg1[%51] : memref<16xi32, #tpu.memory_space<smem>>
    %c7_i32_28 = arith.constant 7 : i32
    %c0_i32_29 = arith.constant 0 : i32
    %53 = tpu.memref_slice %arg2[%52, %c0_i32_29] : memref<16x32xf32, #tpu.memory_space<any>> -> memref<1x32xf32, #tpu.memory_space<any>>
    %c7_i32_30 = arith.constant 7 : i32
    %c0_i32_31 = arith.constant 0 : i32
    %54 = tpu.memref_slice %arg4[%c7_i32_30, %c0_i32_31] : memref<16x32xf32, #tpu.memory_space<vmem>> -> memref<1x32xf32, #tpu.memory_space<vmem>>
    %55 = tpu.memref_slice %arg5[%c7_i32_28] : memref<16x!tpu.dma_semaphore, #tpu.memory_space<semaphore_mem>> -> memref<1x!tpu.dma_semaphore, #tpu.memory_space<semaphore_mem>>
    %56 = tpu.memref_squeeze %55 : memref<1x!tpu.dma_semaphore, #tpu.memory_space<semaphore_mem>> -> memref<!tpu.dma_semaphore, #tpu.memory_space<semaphore_mem>>
    tpu.enqueue_dma source(%53 : memref<1x32xf32, #tpu.memory_space<any>>) target(%54 : memref<1x32xf32, #tpu.memory_space<vmem>>) target_semaphore(%56 : memref<!tpu.dma_semaphore, #tpu.memory_space<semaphore_mem>>)
    %c8_i32 = arith.constant 8 : i32
    %57 = arith.addi %0, %c8_i32 : i32
    %58 = arith.index_cast %57 : i32 to index
    %59 = memref.load %arg1[%58] : memref<16xi32, #tpu.memory_space<smem>>
    %c8_i32_32 = arith.constant 8 : i32
    %c0_i32_33 = arith.constant 0 : i32
    %60 = tpu.memref_slice %arg2[%59, %c0_i32_33] : memref<16x32xf32, #tpu.memory_space<any>> -> memref<1x32xf32, #tpu.memory_space<any>>
    %c8_i32_34 = arith.constant 8 : i32
    %c0_i32_35 = arith.constant 0 : i32
    %61 = tpu.memref_slice %arg4[%c8_i32_34, %c0_i32_35] : memref<16x32xf32, #tpu.memory_space<vmem>> -> memref<1x32xf32, #tpu.memory_space<vmem>>
    %62 = tpu.memref_slice %arg5[%c8_i32_32] : memref<16x!tpu.dma_semaphore, #tpu.memory_space<semaphore_mem>> -> memref<1x!tpu.dma_semaphore, #tpu.memory_space<semaphore_mem>>
    %63 = tpu.memref_squeeze %62 : memref<1x!tpu.dma_semaphore, #tpu.memory_space<semaphore_mem>> -> memref<!tpu.dma_semaphore, #tpu.memory_space<semaphore_mem>>
    tpu.enqueue_dma source(%60 : memref<1x32xf32, #tpu.memory_space<any>>) target(%61 : memref<1x32xf32, #tpu.memory_space<vmem>>) target_semaphore(%63 : memref<!tpu.dma_semaphore, #tpu.memory_space<semaphore_mem>>)
    %c9_i32 = arith.constant 9 : i32
    %64 = arith.addi %0, %c9_i32 : i32
    %65 = arith.index_cast %64 : i32 to index
    %66 = memref.load %arg1[%65] : memref<16xi32, #tpu.memory_space<smem>>
    %c9_i32_36 = arith.constant 9 : i32
    %c0_i32_37 = arith.constant 0 : i32
    %67 = tpu.memref_slice %arg2[%66, %c0_i32_37] : memref<16x32xf32, #tpu.memory_space<any>> -> memref<1x32xf32, #tpu.memory_space<any>>
    %c9_i32_38 = arith.constant 9 : i32
    %c0_i32_39 = arith.constant 0 : i32
    %68 = tpu.memref_slice %arg4[%c9_i32_38, %c0_i32_39] : memref<16x32xf32, #tpu.memory_space<vmem>> -> memref<1x32xf32, #tpu.memory_space<vmem>>
    %69 = tpu.memref_slice %arg5[%c9_i32_36] : memref<16x!tpu.dma_semaphore, #tpu.memory_space<semaphore_mem>> -> memref<1x!tpu.dma_semaphore, #tpu.memory_space<semaphore_mem>>
    %70 = tpu.memref_squeeze %69 : memref<1x!tpu.dma_semaphore, #tpu.memory_space<semaphore_mem>> -> memref<!tpu.dma_semaphore, #tpu.memory_space<semaphore_mem>>
    tpu.enqueue_dma source(%67 : memref<1x32xf32, #tpu.memory_space<any>>) target(%68 : memref<1x32xf32, #tpu.memory_space<vmem>>) target_semaphore(%70 : memref<!tpu.dma_semaphore, #tpu.memory_space<semaphore_mem>>)
    %c10_i32 = arith.constant 10 : i32
    %71 = arith.addi %0, %c10_i32 : i32
    %72 = arith.index_cast %71 : i32 to index
    %73 = memref.load %arg1[%72] : memref<16xi32, #tpu.memory_space<smem>>
    %c10_i32_40 = arith.constant 10 : i32
    %c0_i32_41 = arith.constant 0 : i32
    %74 = tpu.memref_slice %arg2[%73, %c0_i32_41] : memref<16x32xf32, #tpu.memory_space<any>> -> memref<1x32xf32, #tpu.memory_space<any>>
    %c10_i32_42 = arith.constant 10 : i32
    %c0_i32_43 = arith.constant 0 : i32
    %75 = tpu.memref_slice %arg4[%c10_i32_42, %c0_i32_43] : memref<16x32xf32, #tpu.memory_space<vmem>> -> memref<1x32xf32, #tpu.memory_space<vmem>>
    %76 = tpu.memref_slice %arg5[%c10_i32_40] : memref<16x!tpu.dma_semaphore, #tpu.memory_space<semaphore_mem>> -> memref<1x!tpu.dma_semaphore, #tpu.memory_space<semaphore_mem>>
    %77 = tpu.memref_squeeze %76 : memref<1x!tpu.dma_semaphore, #tpu.memory_space<semaphore_mem>> -> memref<!tpu.dma_semaphore, #tpu.memory_space<semaphore_mem>>
    tpu.enqueue_dma source(%74 : memref<1x32xf32, #tpu.memory_space<any>>) target(%75 : memref<1x32xf32, #tpu.memory_space<vmem>>) target_semaphore(%77 : memref<!tpu.dma_semaphore, #tpu.memory_space<semaphore_mem>>)
    %c11_i32 = arith.constant 11 : i32
    %78 = arith.addi %0, %c11_i32 : i32
    %79 = arith.index_cast %78 : i32 to index
    %80 = memref.load %arg1[%79] : memref<16xi32, #tpu.memory_space<smem>>
    %c11_i32_44 = arith.constant 11 : i32
    %c0_i32_45 = arith.constant 0 : i32
    %81 = tpu.memref_slice %arg2[%80, %c0_i32_45] : memref<16x32xf32, #tpu.memory_space<any>> -> memref<1x32xf32, #tpu.memory_space<any>>
    %c11_i32_46 = arith.constant 11 : i32
    %c0_i32_47 = arith.constant 0 : i32
    %82 = tpu.memref_slice %arg4[%c11_i32_46, %c0_i32_47] : memref<16x32xf32, #tpu.memory_space<vmem>> -> memref<1x32xf32, #tpu.memory_space<vmem>>
    %83 = tpu.memref_slice %arg5[%c11_i32_44] : memref<16x!tpu.dma_semaphore, #tpu.memory_space<semaphore_mem>> -> memref<1x!tpu.dma_semaphore, #tpu.memory_space<semaphore_mem>>
    %84 = tpu.memref_squeeze %83 : memref<1x!tpu.dma_semaphore, #tpu.memory_space<semaphore_mem>> -> memref<!tpu.dma_semaphore, #tpu.memory_space<semaphore_mem>>
    tpu.enqueue_dma source(%81 : memref<1x32xf32, #tpu.memory_space<any>>) target(%82 : memref<1x32xf32, #tpu.memory_space<vmem>>) target_semaphore(%84 : memref<!tpu.dma_semaphore, #tpu.memory_space<semaphore_mem>>)
    %c12_i32 = arith.constant 12 : i32
    %85 = arith.addi %0, %c12_i32 : i32
    %86 = arith.index_cast %85 : i32 to index
    %87 = memref.load %arg1[%86] : memref<16xi32, #tpu.memory_space<smem>>
    %c12_i32_48 = arith.constant 12 : i32
    %c0_i32_49 = arith.constant 0 : i32
    %88 = tpu.memref_slice %arg2[%87, %c0_i32_49] : memref<16x32xf32, #tpu.memory_space<any>> -> memref<1x32xf32, #tpu.memory_space<any>>
    %c12_i32_50 = arith.constant 12 : i32
    %c0_i32_51 = arith.constant 0 : i32
    %89 = tpu.memref_slice %arg4[%c12_i32_50, %c0_i32_51] : memref<16x32xf32, #tpu.memory_space<vmem>> -> memref<1x32xf32, #tpu.memory_space<vmem>>
    %90 = tpu.memref_slice %arg5[%c12_i32_48] : memref<16x!tpu.dma_semaphore, #tpu.memory_space<semaphore_mem>> -> memref<1x!tpu.dma_semaphore, #tpu.memory_space<semaphore_mem>>
    %91 = tpu.memref_squeeze %90 : memref<1x!tpu.dma_semaphore, #tpu.memory_space<semaphore_mem>> -> memref<!tpu.dma_semaphore, #tpu.memory_space<semaphore_mem>>
    tpu.enqueue_dma source(%88 : memref<1x32xf32, #tpu.memory_space<any>>) target(%89 : memref<1x32xf32, #tpu.memory_space<vmem>>) target_semaphore(%91 : memref<!tpu.dma_semaphore, #tpu.memory_space<semaphore_mem>>)
    %c13_i32 = arith.constant 13 : i32
    %92 = arith.addi %0, %c13_i32 : i32
    %93 = arith.index_cast %92 : i32 to index
    %94 = memref.load %arg1[%93] : memref<16xi32, #tpu.memory_space<smem>>
    %c13_i32_52 = arith.constant 13 : i32
    %c0_i32_53 = arith.constant 0 : i32
    %95 = tpu.memref_slice %arg2[%94, %c0_i32_53] : memref<16x32xf32, #tpu.memory_space<any>> -> memref<1x32xf32, #tpu.memory_space<any>>
    %c13_i32_54 = arith.constant 13 : i32
    %c0_i32_55 = arith.constant 0 : i32
    %96 = tpu.memref_slice %arg4[%c13_i32_54, %c0_i32_55] : memref<16x32xf32, #tpu.memory_space<vmem>> -> memref<1x32xf32, #tpu.memory_space<vmem>>
    %97 = tpu.memref_slice %arg5[%c13_i32_52] : memref<16x!tpu.dma_semaphore, #tpu.memory_space<semaphore_mem>> -> memref<1x!tpu.dma_semaphore, #tpu.memory_space<semaphore_mem>>
    %98 = tpu.memref_squeeze %97 : memref<1x!tpu.dma_semaphore, #tpu.memory_space<semaphore_mem>> -> memref<!tpu.dma_semaphore, #tpu.memory_space<semaphore_mem>>
    tpu.enqueue_dma source(%95 : memref<1x32xf32, #tpu.memory_space<any>>) target(%96 : memref<1x32xf32, #tpu.memory_space<vmem>>) target_semaphore(%98 : memref<!tpu.dma_semaphore, #tpu.memory_space<semaphore_mem>>)
    %c14_i32 = arith.constant 14 : i32
    %99 = arith.addi %0, %c14_i32 : i32
    %100 = arith.index_cast %99 : i32 to index
    %101 = memref.load %arg1[%100] : memref<16xi32, #tpu.memory_space<smem>>
    %c14_i32_56 = arith.constant 14 : i32
    %c0_i32_57 = arith.constant 0 : i32
    %102 = tpu.memref_slice %arg2[%101, %c0_i32_57] : memref<16x32xf32, #tpu.memory_space<any>> -> memref<1x32xf32, #tpu.memory_space<any>>
    %c14_i32_58 = arith.constant 14 : i32
    %c0_i32_59 = arith.constant 0 : i32
    %103 = tpu.memref_slice %arg4[%c14_i32_58, %c0_i32_59] : memref<16x32xf32, #tpu.memory_space<vmem>> -> memref<1x32xf32, #tpu.memory_space<vmem>>
    %104 = tpu.memref_slice %arg5[%c14_i32_56] : memref<16x!tpu.dma_semaphore, #tpu.memory_space<semaphore_mem>> -> memref<1x!tpu.dma_semaphore, #tpu.memory_space<semaphore_mem>>
    %105 = tpu.memref_squeeze %104 : memref<1x!tpu.dma_semaphore, #tpu.memory_space<semaphore_mem>> -> memref<!tpu.dma_semaphore, #tpu.memory_space<semaphore_mem>>
    tpu.enqueue_dma source(%102 : memref<1x32xf32, #tpu.memory_space<any>>) target(%103 : memref<1x32xf32, #tpu.memory_space<vmem>>) target_semaphore(%105 : memref<!tpu.dma_semaphore, #tpu.memory_space<semaphore_mem>>)
    %c15_i32 = arith.constant 15 : i32
    %106 = arith.addi %0, %c15_i32 : i32
    %107 = arith.index_cast %106 : i32 to index
    %108 = memref.load %arg1[%107] : memref<16xi32, #tpu.memory_space<smem>>
    %c15_i32_60 = arith.constant 15 : i32
    %c0_i32_61 = arith.constant 0 : i32
    %109 = tpu.memref_slice %arg2[%108, %c0_i32_61] : memref<16x32xf32, #tpu.memory_space<any>> -> memref<1x32xf32, #tpu.memory_space<any>>
    %c15_i32_62 = arith.constant 15 : i32
    %c0_i32_63 = arith.constant 0 : i32
    %110 = tpu.memref_slice %arg4[%c15_i32_62, %c0_i32_63] : memref<16x32xf32, #tpu.memory_space<vmem>> -> memref<1x32xf32, #tpu.memory_space<vmem>>
    %111 = tpu.memref_slice %arg5[%c15_i32_60] : memref<16x!tpu.dma_semaphore, #tpu.memory_space<semaphore_mem>> -> memref<1x!tpu.dma_semaphore, #tpu.memory_space<semaphore_mem>>
    %112 = tpu.memref_squeeze %111 : memref<1x!tpu.dma_semaphore, #tpu.memory_space<semaphore_mem>> -> memref<!tpu.dma_semaphore, #tpu.memory_space<semaphore_mem>>
    tpu.enqueue_dma source(%109 : memref<1x32xf32, #tpu.memory_space<any>>) target(%110 : memref<1x32xf32, #tpu.memory_space<vmem>>) target_semaphore(%112 : memref<!tpu.dma_semaphore, #tpu.memory_space<semaphore_mem>>)
    %c0_i32_64 = arith.constant 0 : i32
    %c0_i32_65 = arith.constant 0 : i32
    %113 = tpu.memref_slice %arg2[%3, %c0_i32_65] : memref<16x32xf32, #tpu.memory_space<any>> -> memref<1x32xf32, #tpu.memory_space<any>>
    %c0_i32_66 = arith.constant 0 : i32
    %c0_i32_67 = arith.constant 0 : i32
    %114 = tpu.memref_slice %arg4[%c0_i32_66, %c0_i32_67] : memref<16x32xf32, #tpu.memory_space<vmem>> -> memref<1x32xf32, #tpu.memory_space<vmem>>
    %115 = tpu.memref_slice %arg5[%c0_i32_64] : memref<16x!tpu.dma_semaphore, #tpu.memory_space<semaphore_mem>> -> memref<1x!tpu.dma_semaphore, #tpu.memory_space<semaphore_mem>>
    %116 = tpu.memref_squeeze %115 : memref<1x!tpu.dma_semaphore, #tpu.memory_space<semaphore_mem>> -> memref<!tpu.dma_semaphore, #tpu.memory_space<semaphore_mem>>
    tpu.wait_dma2 semaphore(%116 : memref<!tpu.dma_semaphore, #tpu.memory_space<semaphore_mem>>) src(%113 : memref<1x32xf32, #tpu.memory_space<any>>) dst(%114 : memref<1x32xf32, #tpu.memory_space<vmem>>)
    %c1_i32_68 = arith.constant 1 : i32
    %c0_i32_69 = arith.constant 0 : i32
    %117 = tpu.memref_slice %arg2[%10, %c0_i32_69] : memref<16x32xf32, #tpu.memory_space<any>> -> memref<1x32xf32, #tpu.memory_space<any>>
    %c1_i32_70 = arith.constant 1 : i32
    %c0_i32_71 = arith.constant 0 : i32
    %118 = tpu.memref_slice %arg4[%c1_i32_70, %c0_i32_71] : memref<16x32xf32, #tpu.memory_space<vmem>> -> memref<1x32xf32, #tpu.memory_space<vmem>>
    %119 = tpu.memref_slice %arg5[%c1_i32_68] : memref<16x!tpu.dma_semaphore, #tpu.memory_space<semaphore_mem>> -> memref<1x!tpu.dma_semaphore, #tpu.memory_space<semaphore_mem>>
    %120 = tpu.memref_squeeze %119 : memref<1x!tpu.dma_semaphore, #tpu.memory_space<semaphore_mem>> -> memref<!tpu.dma_semaphore, #tpu.memory_space<semaphore_mem>>
    tpu.wait_dma2 semaphore(%120 : memref<!tpu.dma_semaphore, #tpu.memory_space<semaphore_mem>>) src(%117 : memref<1x32xf32, #tpu.memory_space<any>>) dst(%118 : memref<1x32xf32, #tpu.memory_space<vmem>>)
    %c2_i32_72 = arith.constant 2 : i32
    %c0_i32_73 = arith.constant 0 : i32
    %121 = tpu.memref_slice %arg2[%17, %c0_i32_73] : memref<16x32xf32, #tpu.memory_space<any>> -> memref<1x32xf32, #tpu.memory_space<any>>
    %c2_i32_74 = arith.constant 2 : i32
    %c0_i32_75 = arith.constant 0 : i32
    %122 = tpu.memref_slice %arg4[%c2_i32_74, %c0_i32_75] : memref<16x32xf32, #tpu.memory_space<vmem>> -> memref<1x32xf32, #tpu.memory_space<vmem>>
    %123 = tpu.memref_slice %arg5[%c2_i32_72] : memref<16x!tpu.dma_semaphore, #tpu.memory_space<semaphore_mem>> -> memref<1x!tpu.dma_semaphore, #tpu.memory_space<semaphore_mem>>
    %124 = tpu.memref_squeeze %123 : memref<1x!tpu.dma_semaphore, #tpu.memory_space<semaphore_mem>> -> memref<!tpu.dma_semaphore, #tpu.memory_space<semaphore_mem>>
    tpu.wait_dma2 semaphore(%124 : memref<!tpu.dma_semaphore, #tpu.memory_space<semaphore_mem>>) src(%121 : memref<1x32xf32, #tpu.memory_space<any>>) dst(%122 : memref<1x32xf32, #tpu.memory_space<vmem>>)
    %c3_i32_76 = arith.constant 3 : i32
    %c0_i32_77 = arith.constant 0 : i32
    %125 = tpu.memref_slice %arg2[%24, %c0_i32_77] : memref<16x32xf32, #tpu.memory_space<any>> -> memref<1x32xf32, #tpu.memory_space<any>>
    %c3_i32_78 = arith.constant 3 : i32
    %c0_i32_79 = arith.constant 0 : i32
    %126 = tpu.memref_slice %arg4[%c3_i32_78, %c0_i32_79] : memref<16x32xf32, #tpu.memory_space<vmem>> -> memref<1x32xf32, #tpu.memory_space<vmem>>
    %127 = tpu.memref_slice %arg5[%c3_i32_76] : memref<16x!tpu.dma_semaphore, #tpu.memory_space<semaphore_mem>> -> memref<1x!tpu.dma_semaphore, #tpu.memory_space<semaphore_mem>>
    %128 = tpu.memref_squeeze %127 : memref<1x!tpu.dma_semaphore, #tpu.memory_space<semaphore_mem>> -> memref<!tpu.dma_semaphore, #tpu.memory_space<semaphore_mem>>
    tpu.wait_dma2 semaphore(%128 : memref<!tpu.dma_semaphore, #tpu.memory_space<semaphore_mem>>) src(%125 : memref<1x32xf32, #tpu.memory_space<any>>) dst(%126 : memref<1x32xf32, #tpu.memory_space<vmem>>)
    %c4_i32_80 = arith.constant 4 : i32
    %c0_i32_81 = arith.constant 0 : i32
    %129 = tpu.memref_slice %arg2[%31, %c0_i32_81] : memref<16x32xf32, #tpu.memory_space<any>> -> memref<1x32xf32, #tpu.memory_space<any>>
    %c4_i32_82 = arith.constant 4 : i32
    %c0_i32_83 = arith.constant 0 : i32
    %130 = tpu.memref_slice %arg4[%c4_i32_82, %c0_i32_83] : memref<16x32xf32, #tpu.memory_space<vmem>> -> memref<1x32xf32, #tpu.memory_space<vmem>>
    %131 = tpu.memref_slice %arg5[%c4_i32_80] : memref<16x!tpu.dma_semaphore, #tpu.memory_space<semaphore_mem>> -> memref<1x!tpu.dma_semaphore, #tpu.memory_space<semaphore_mem>>
    %132 = tpu.memref_squeeze %131 : memref<1x!tpu.dma_semaphore, #tpu.memory_space<semaphore_mem>> -> memref<!tpu.dma_semaphore, #tpu.memory_space<semaphore_mem>>
    tpu.wait_dma2 semaphore(%132 : memref<!tpu.dma_semaphore, #tpu.memory_space<semaphore_mem>>) src(%129 : memref<1x32xf32, #tpu.memory_space<any>>) dst(%130 : memref<1x32xf32, #tpu.memory_space<vmem>>)
    %c5_i32_84 = arith.constant 5 : i32
    %c0_i32_85 = arith.constant 0 : i32
    %133 = tpu.memref_slice %arg2[%38, %c0_i32_85] : memref<16x32xf32, #tpu.memory_space<any>> -> memref<1x32xf32, #tpu.memory_space<any>>
    %c5_i32_86 = arith.constant 5 : i32
    %c0_i32_87 = arith.constant 0 : i32
    %134 = tpu.memref_slice %arg4[%c5_i32_86, %c0_i32_87] : memref<16x32xf32, #tpu.memory_space<vmem>> -> memref<1x32xf32, #tpu.memory_space<vmem>>
    %135 = tpu.memref_slice %arg5[%c5_i32_84] : memref<16x!tpu.dma_semaphore, #tpu.memory_space<semaphore_mem>> -> memref<1x!tpu.dma_semaphore, #tpu.memory_space<semaphore_mem>>
    %136 = tpu.memref_squeeze %135 : memref<1x!tpu.dma_semaphore, #tpu.memory_space<semaphore_mem>> -> memref<!tpu.dma_semaphore, #tpu.memory_space<semaphore_mem>>
    tpu.wait_dma2 semaphore(%136 : memref<!tpu.dma_semaphore, #tpu.memory_space<semaphore_mem>>) src(%133 : memref<1x32xf32, #tpu.memory_space<any>>) dst(%134 : memref<1x32xf32, #tpu.memory_space<vmem>>)
    %c6_i32_88 = arith.constant 6 : i32
    %c0_i32_89 = arith.constant 0 : i32
    %137 = tpu.memref_slice %arg2[%45, %c0_i32_89] : memref<16x32xf32, #tpu.memory_space<any>> -> memref<1x32xf32, #tpu.memory_space<any>>
    %c6_i32_90 = arith.constant 6 : i32
    %c0_i32_91 = arith.constant 0 : i32
    %138 = tpu.memref_slice %arg4[%c6_i32_90, %c0_i32_91] : memref<16x32xf32, #tpu.memory_space<vmem>> -> memref<1x32xf32, #tpu.memory_space<vmem>>
    %139 = tpu.memref_slice %arg5[%c6_i32_88] : memref<16x!tpu.dma_semaphore, #tpu.memory_space<semaphore_mem>> -> memref<1x!tpu.dma_semaphore, #tpu.memory_space<semaphore_mem>>
    %140 = tpu.memref_squeeze %139 : memref<1x!tpu.dma_semaphore, #tpu.memory_space<semaphore_mem>> -> memref<!tpu.dma_semaphore, #tpu.memory_space<semaphore_mem>>
    tpu.wait_dma2 semaphore(%140 : memref<!tpu.dma_semaphore, #tpu.memory_space<semaphore_mem>>) src(%137 : memref<1x32xf32, #tpu.memory_space<any>>) dst(%138 : memref<1x32xf32, #tpu.memory_space<vmem>>)
    %c7_i32_92 = arith.constant 7 : i32
    %c0_i32_93 = arith.constant 0 : i32
    %141 = tpu.memref_slice %arg2[%52, %c0_i32_93] : memref<16x32xf32, #tpu.memory_space<any>> -> memref<1x32xf32, #tpu.memory_space<any>>
    %c7_i32_94 = arith.constant 7 : i32
    %c0_i32_95 = arith.constant 0 : i32
    %142 = tpu.memref_slice %arg4[%c7_i32_94, %c0_i32_95] : memref<16x32xf32, #tpu.memory_space<vmem>> -> memref<1x32xf32, #tpu.memory_space<vmem>>
    %143 = tpu.memref_slice %arg5[%c7_i32_92] : memref<16x!tpu.dma_semaphore, #tpu.memory_space<semaphore_mem>> -> memref<1x!tpu.dma_semaphore, #tpu.memory_space<semaphore_mem>>
    %144 = tpu.memref_squeeze %143 : memref<1x!tpu.dma_semaphore, #tpu.memory_space<semaphore_mem>> -> memref<!tpu.dma_semaphore, #tpu.memory_space<semaphore_mem>>
    tpu.wait_dma2 semaphore(%144 : memref<!tpu.dma_semaphore, #tpu.memory_space<semaphore_mem>>) src(%141 : memref<1x32xf32, #tpu.memory_space<any>>) dst(%142 : memref<1x32xf32, #tpu.memory_space<vmem>>)
    %c8_i32_96 = arith.constant 8 : i32
    %c0_i32_97 = arith.constant 0 : i32
    %145 = tpu.memref_slice %arg2[%59, %c0_i32_97] : memref<16x32xf32, #tpu.memory_space<any>> -> memref<1x32xf32, #tpu.memory_space<any>>
    %c8_i32_98 = arith.constant 8 : i32
    %c0_i32_99 = arith.constant 0 : i32
    %146 = tpu.memref_slice %arg4[%c8_i32_98, %c0_i32_99] : memref<16x32xf32, #tpu.memory_space<vmem>> -> memref<1x32xf32, #tpu.memory_space<vmem>>
    %147 = tpu.memref_slice %arg5[%c8_i32_96] : memref<16x!tpu.dma_semaphore, #tpu.memory_space<semaphore_mem>> -> memref<1x!tpu.dma_semaphore, #tpu.memory_space<semaphore_mem>>
    %148 = tpu.memref_squeeze %147 : memref<1x!tpu.dma_semaphore, #tpu.memory_space<semaphore_mem>> -> memref<!tpu.dma_semaphore, #tpu.memory_space<semaphore_mem>>
    tpu.wait_dma2 semaphore(%148 : memref<!tpu.dma_semaphore, #tpu.memory_space<semaphore_mem>>) src(%145 : memref<1x32xf32, #tpu.memory_space<any>>) dst(%146 : memref<1x32xf32, #tpu.memory_space<vmem>>)
    %c9_i32_100 = arith.constant 9 : i32
    %c0_i32_101 = arith.constant 0 : i32
    %149 = tpu.memref_slice %arg2[%66, %c0_i32_101] : memref<16x32xf32, #tpu.memory_space<any>> -> memref<1x32xf32, #tpu.memory_space<any>>
    %c9_i32_102 = arith.constant 9 : i32
    %c0_i32_103 = arith.constant 0 : i32
    %150 = tpu.memref_slice %arg4[%c9_i32_102, %c0_i32_103] : memref<16x32xf32, #tpu.memory_space<vmem>> -> memref<1x32xf32, #tpu.memory_space<vmem>>
    %151 = tpu.memref_slice %arg5[%c9_i32_100] : memref<16x!tpu.dma_semaphore, #tpu.memory_space<semaphore_mem>> -> memref<1x!tpu.dma_semaphore, #tpu.memory_space<semaphore_mem>>
    %152 = tpu.memref_squeeze %151 : memref<1x!tpu.dma_semaphore, #tpu.memory_space<semaphore_mem>> -> memref<!tpu.dma_semaphore, #tpu.memory_space<semaphore_mem>>
    tpu.wait_dma2 semaphore(%152 : memref<!tpu.dma_semaphore, #tpu.memory_space<semaphore_mem>>) src(%149 : memref<1x32xf32, #tpu.memory_space<any>>) dst(%150 : memref<1x32xf32, #tpu.memory_space<vmem>>)
    %c10_i32_104 = arith.constant 10 : i32
    %c0_i32_105 = arith.constant 0 : i32
    %153 = tpu.memref_slice %arg2[%73, %c0_i32_105] : memref<16x32xf32, #tpu.memory_space<any>> -> memref<1x32xf32, #tpu.memory_space<any>>
    %c10_i32_106 = arith.constant 10 : i32
    %c0_i32_107 = arith.constant 0 : i32
    %154 = tpu.memref_slice %arg4[%c10_i32_106, %c0_i32_107] : memref<16x32xf32, #tpu.memory_space<vmem>> -> memref<1x32xf32, #tpu.memory_space<vmem>>
    %155 = tpu.memref_slice %arg5[%c10_i32_104] : memref<16x!tpu.dma_semaphore, #tpu.memory_space<semaphore_mem>> -> memref<1x!tpu.dma_semaphore, #tpu.memory_space<semaphore_mem>>
    %156 = tpu.memref_squeeze %155 : memref<1x!tpu.dma_semaphore, #tpu.memory_space<semaphore_mem>> -> memref<!tpu.dma_semaphore, #tpu.memory_space<semaphore_mem>>
    tpu.wait_dma2 semaphore(%156 : memref<!tpu.dma_semaphore, #tpu.memory_space<semaphore_mem>>) src(%153 : memref<1x32xf32, #tpu.memory_space<any>>) dst(%154 : memref<1x32xf32, #tpu.memory_space<vmem>>)
    %c11_i32_108 = arith.constant 11 : i32
    %c0_i32_109 = arith.constant 0 : i32
    %157 = tpu.memref_slice %arg2[%80, %c0_i32_109] : memref<16x32xf32, #tpu.memory_space<any>> -> memref<1x32xf32, #tpu.memory_space<any>>
    %c11_i32_110 = arith.constant 11 : i32
    %c0_i32_111 = arith.constant 0 : i32
    %158 = tpu.memref_slice %arg4[%c11_i32_110, %c0_i32_111] : memref<16x32xf32, #tpu.memory_space<vmem>> -> memref<1x32xf32, #tpu.memory_space<vmem>>
    %159 = tpu.memref_slice %arg5[%c11_i32_108] : memref<16x!tpu.dma_semaphore, #tpu.memory_space<semaphore_mem>> -> memref<1x!tpu.dma_semaphore, #tpu.memory_space<semaphore_mem>>
    %160 = tpu.memref_squeeze %159 : memref<1x!tpu.dma_semaphore, #tpu.memory_space<semaphore_mem>> -> memref<!tpu.dma_semaphore, #tpu.memory_space<semaphore_mem>>
    tpu.wait_dma2 semaphore(%160 : memref<!tpu.dma_semaphore, #tpu.memory_space<semaphore_mem>>) src(%157 : memref<1x32xf32, #tpu.memory_space<any>>) dst(%158 : memref<1x32xf32, #tpu.memory_space<vmem>>)
    %c12_i32_112 = arith.constant 12 : i32
    %c0_i32_113 = arith.constant 0 : i32
    %161 = tpu.memref_slice %arg2[%87, %c0_i32_113] : memref<16x32xf32, #tpu.memory_space<any>> -> memref<1x32xf32, #tpu.memory_space<any>>
    %c12_i32_114 = arith.constant 12 : i32
    %c0_i32_115 = arith.constant 0 : i32
    %162 = tpu.memref_slice %arg4[%c12_i32_114, %c0_i32_115] : memref<16x32xf32, #tpu.memory_space<vmem>> -> memref<1x32xf32, #tpu.memory_space<vmem>>
    %163 = tpu.memref_slice %arg5[%c12_i32_112] : memref<16x!tpu.dma_semaphore, #tpu.memory_space<semaphore_mem>> -> memref<1x!tpu.dma_semaphore, #tpu.memory_space<semaphore_mem>>
    %164 = tpu.memref_squeeze %163 : memref<1x!tpu.dma_semaphore, #tpu.memory_space<semaphore_mem>> -> memref<!tpu.dma_semaphore, #tpu.memory_space<semaphore_mem>>
    tpu.wait_dma2 semaphore(%164 : memref<!tpu.dma_semaphore, #tpu.memory_space<semaphore_mem>>) src(%161 : memref<1x32xf32, #tpu.memory_space<any>>) dst(%162 : memref<1x32xf32, #tpu.memory_space<vmem>>)
    %c13_i32_116 = arith.constant 13 : i32
    %c0_i32_117 = arith.constant 0 : i32
    %165 = tpu.memref_slice %arg2[%94, %c0_i32_117] : memref<16x32xf32, #tpu.memory_space<any>> -> memref<1x32xf32, #tpu.memory_space<any>>
    %c13_i32_118 = arith.constant 13 : i32
    %c0_i32_119 = arith.constant 0 : i32
    %166 = tpu.memref_slice %arg4[%c13_i32_118, %c0_i32_119] : memref<16x32xf32, #tpu.memory_space<vmem>> -> memref<1x32xf32, #tpu.memory_space<vmem>>
    %167 = tpu.memref_slice %arg5[%c13_i32_116] : memref<16x!tpu.dma_semaphore, #tpu.memory_space<semaphore_mem>> -> memref<1x!tpu.dma_semaphore, #tpu.memory_space<semaphore_mem>>
    %168 = tpu.memref_squeeze %167 : memref<1x!tpu.dma_semaphore, #tpu.memory_space<semaphore_mem>> -> memref<!tpu.dma_semaphore, #tpu.memory_space<semaphore_mem>>
    tpu.wait_dma2 semaphore(%168 : memref<!tpu.dma_semaphore, #tpu.memory_space<semaphore_mem>>) src(%165 : memref<1x32xf32, #tpu.memory_space<any>>) dst(%166 : memref<1x32xf32, #tpu.memory_space<vmem>>)
    %c14_i32_120 = arith.constant 14 : i32
    %c0_i32_121 = arith.constant 0 : i32
    %169 = tpu.memref_slice %arg2[%101, %c0_i32_121] : memref<16x32xf32, #tpu.memory_space<any>> -> memref<1x32xf32, #tpu.memory_space<any>>
    %c14_i32_122 = arith.constant 14 : i32
    %c0_i32_123 = arith.constant 0 : i32
    %170 = tpu.memref_slice %arg4[%c14_i32_122, %c0_i32_123] : memref<16x32xf32, #tpu.memory_space<vmem>> -> memref<1x32xf32, #tpu.memory_space<vmem>>
    %171 = tpu.memref_slice %arg5[%c14_i32_120] : memref<16x!tpu.dma_semaphore, #tpu.memory_space<semaphore_mem>> -> memref<1x!tpu.dma_semaphore, #tpu.memory_space<semaphore_mem>>
    %172 = tpu.memref_squeeze %171 : memref<1x!tpu.dma_semaphore, #tpu.memory_space<semaphore_mem>> -> memref<!tpu.dma_semaphore, #tpu.memory_space<semaphore_mem>>
    tpu.wait_dma2 semaphore(%172 : memref<!tpu.dma_semaphore, #tpu.memory_space<semaphore_mem>>) src(%169 : memref<1x32xf32, #tpu.memory_space<any>>) dst(%170 : memref<1x32xf32, #tpu.memory_space<vmem>>)
    %c15_i32_124 = arith.constant 15 : i32
    %c0_i32_125 = arith.constant 0 : i32
    %173 = tpu.memref_slice %arg2[%108, %c0_i32_125] : memref<16x32xf32, #tpu.memory_space<any>> -> memref<1x32xf32, #tpu.memory_space<any>>
    %c15_i32_126 = arith.constant 15 : i32
    %c0_i32_127 = arith.constant 0 : i32
    %174 = tpu.memref_slice %arg4[%c15_i32_126, %c0_i32_127] : memref<16x32xf32, #tpu.memory_space<vmem>> -> memref<1x32xf32, #tpu.memory_space<vmem>>
    %175 = tpu.memref_slice %arg5[%c15_i32_124] : memref<16x!tpu.dma_semaphore, #tpu.memory_space<semaphore_mem>> -> memref<1x!tpu.dma_semaphore, #tpu.memory_space<semaphore_mem>>
    %176 = tpu.memref_squeeze %175 : memref<1x!tpu.dma_semaphore, #tpu.memory_space<semaphore_mem>> -> memref<!tpu.dma_semaphore, #tpu.memory_space<semaphore_mem>>
    tpu.wait_dma2 semaphore(%176 : memref<!tpu.dma_semaphore, #tpu.memory_space<semaphore_mem>>) src(%173 : memref<1x32xf32, #tpu.memory_space<any>>) dst(%174 : memref<1x32xf32, #tpu.memory_space<vmem>>)
    %c0 = arith.constant 0 : index
    %c0_128 = arith.constant 0 : index
    %177 = vector.load %arg4[%c0, %c0_128] : memref<16x32xf32, #tpu.memory_space<vmem>>, vector<16x32xf32>
    %c0_129 = arith.constant 0 : index
    %c0_130 = arith.constant 0 : index
    %178 = vector.load %arg3[%c0_129, %c0_130] : memref<16x32xf32, #tpu.memory_space<vmem>>, vector<16x32xf32>
    tpu.vector_store %arg3[%c0_129, %c0_130], %177 {strides = array<i32>} : memref<16x32xf32, #tpu.memory_space<vmem>>, vector<16x32xf32>,
    return
  }
  func.func @transform_1(%arg0: i32, %arg1: memref<16xi32, #tpu.memory_space<smem>>) -> (i32, i32) {
    %c0_i32 = arith.constant 0 : i32
    %c0_i32_0 = arith.constant 0 : i32
    return %arg0, %c0_i32 : i32, i32
  }
}

</mosaic_0001>

<bundles_post_ra>
// kernel: tpu_custom_call.1
= control target key start
LH: loop header
LB: loop body
LE: loop exit
PB: predicated region body
PF: predicated region fallthrough
CT: control target
= control target key end

     0   :  { %s1320_s0 = inlined_call_operand.hbm [shape: s32[16], index: 0, kind: input, shape index: {}]   ;;  %s1321_s1 = inlined_call_operand.hbm [shape: f32[16,32], index: 1, kind: input, shape index: {}]   ;;  %s1322_s2 = inlined_call_operand.hbm [shape: f32[16,32], index: 2, kind: output, shape index: {}]  }
   0x1   :  { %s546_s11 = scalar_lea.hbm %s1320_s0, 16 }
   0x2   :  { %p547_p0 = scmp.ne.s32.totalorder %s1320_s0, %s546_s11  ;;  %p550_p1 = scmp.lt.u32.totalorder %s546_s11, %s1320_s0 }
   0x4   :  { %p552_p2 = pnand %p550_p1, %p547_p0 }
   0x6   :  { %555 = shalt.err (!%p552_p2)  }
   0x7   :  { %s998_s16 = smov [#allocation5]  }
   0x8   :  { %8 = dma.hbm_to_smem %s1320_s0, 16, %s998_s16, [#allocation4] }
   0x9   :  { %962 = dma.done.wait [#allocation4], 16 }
   0xa   :  { %963 = vsyncadd [#allocation4], 4294967280 }
   0xb   :  { %10 = sfence }
   0xc   :  { %11 = vsyncpa [#allocation7], 0  ;;  %s13_s19 = sld [smem:[#allocation5]]  ;;  %s999_s20 = smov [#allocation2]  }
   0xd   :  { %s23_s21 = sshll.u32 %s999_s20, 4  ;;  %s1045_s22 = sld [smem:[#allocation5 + $0x1]]  ;;  %s1047_s21 = int_to_ptr.vmem [resolvable:$true] %s23_s21 }
   0xe   :  { %s1000_s23 = smov [#allocation2 + $0x1]   ;;  %s1049_s25 = sld [smem:[#allocation5 + $0x2]] }
   0xf   :  { %s40_s24 = sshll.u32 %s1000_s23, 4  ;;  %s1001_s26 = smov [#allocation2 + $0x2]   ;;  %s1051_s24 = int_to_ptr.vmem [resolvable:$true] %s40_s24 }
  0x10   :  { %s57_s0 = sshll.u32 %s1001_s26, 4  ;;  %s1053_s27 = sld [smem:[#allocation5 + $0x3]]  ;;  %s1055_s0 = int_to_ptr.vmem [resolvable:$true] %s57_s0 }
  0x11   :  { %s1064_s8 = scalar_lea.hbm %s1321_s1, 256 }
  0x12   :  { %s479_s28 = sshll.u32 %s13_s19, 4 }
  0x13   :  { %s15_s3 = scalar_lea.hbm %s1321_s1, %s479_s28  ;;  %s481_s4 = sshll.u32 %s1045_s22, 4 }
  0x14   :  { %s556_s5 = scalar_lea.hbm %s15_s3, 16  ;;  %p559_p4 = scmp.lt.u32.totalorder %s15_s3, %s1321_s1 }
  0x15   :  { %p557_p3 = scmp.ne.s32.totalorder %s15_s3, %s556_s5  ;;  %p560_p5 = scmp.lt.u32.totalorder %s1064_s8, %s556_s5 }
  0x16   :  { %p562_p7 = scmp.lt.u32.totalorder %s556_s5, %s15_s3 }
  0x17   :  { %p561_p6 = por %p560_p5, %p559_p4 }
  0x19   :  { %p563_p8 = por %p562_p7, %p561_p6 }
  0x1b   :  { %p564_p9 = pnand %p563_p8, %p557_p3 }
  0x1d   :  { %567 = shalt.err (!%p564_p9)  }
  0x1e   :  { %s568_s11 = scalar_lea.vmem %s1047_s21, 16  ;;  %s1073_s12 = scalar_lea.vmem %s1047_s21, 256 }
  0x1f   :  { %p569_p10 = scmp.ne.s32.totalorder %s1047_s21, %s568_s11  ;;  %p573_p11 = scmp.lt.s32.totalorder %s1047_s21, %s1047_s21 }
  0x20   :  { %p574_p12 = scmp.lt.s32.totalorder %s1073_s12, %s568_s11 }
  0x22   :  { %p575_p13 = por %p574_p12, %p573_p11 }
  0x24   :  { %p576_p0 = pnand %p575_p13, %p569_p10 }
  0x26   :  { %579 = shalt.err (!%p576_p0)  }
  0x27   :  { %26 = dma.hbm_to_vmem [thread:$0]  %s15_s3, 16, %s1047_s21, [#allocation3] }
  0x28   :  { %s30_s15 = scalar_lea.hbm %s1321_s1, %s481_s4  ;;  %s483_s16 = sshll.u32 %s1049_s25, 4 }
  0x29   :  { %s580_s17 = scalar_lea.hbm %s30_s15, 16  ;;  %p583_p2 = scmp.lt.u32.totalorder %s30_s15, %s1321_s1 }
  0x2a   :  { %p581_p1 = scmp.ne.s32.totalorder %s30_s15, %s580_s17  ;;  %p584_p3 = scmp.lt.u32.totalorder %s1064_s8, %s580_s17 }
  0x2b   :  { %p586_p5 = scmp.lt.u32.totalorder %s580_s17, %s30_s15 }
  0x2c   :  { %p585_p4 = por %p584_p3, %p583_p2 }
  0x2e   :  { %p587_p6 = por %p586_p5, %p585_p4 }
  0x30   :  { %p588_p7 = pnand %p587_p6, %p581_p1 }
  0x32   :  { %591 = shalt.err (!%p588_p7)  }
  0x33   :  { %s592_s20 = scalar_lea.vmem %s1051_s24, 16  ;;  %p597_p9 = scmp.lt.s32.totalorder %s1051_s24, %s1047_s21 }
  0x34   :  { %p593_p8 = scmp.ne.s32.totalorder %s1051_s24, %s592_s20  ;;  %p598_p10 = scmp.lt.s32.totalorder %s1073_s12, %s592_s20 }
  0x36   :  { %p599_p11 = por %p598_p10, %p597_p9 }
  0x38   :  { %p600_p12 = pnand %p599_p11, %p593_p8 }
  0x3a   :  { %603 = shalt.err (!%p600_p12)  }
  0x3b   :  { %43 = dma.hbm_to_vmem [thread:$0]  %s30_s15, 16, %s1051_s24, [#allocation3 + $0x1] }
  0x3c   :  { %s47_s25 = scalar_lea.hbm %s1321_s1, %s483_s16  ;;  %s485_s26 = sshll.u32 %s1053_s27, 4 }
  0x3d   :  { %s604_s28 = scalar_lea.hbm %s47_s25, 16  ;;  %p607_p0 = scmp.lt.u32.totalorder %s47_s25, %s1321_s1 }
  0x3e   :  { %p605_p13 = scmp.ne.s32.totalorder %s47_s25, %s604_s28  ;;  %p608_p1 = scmp.lt.u32.totalorder %s1064_s8, %s604_s28 }
  0x3f   :  { %p610_p3 = scmp.lt.u32.totalorder %s604_s28, %s47_s25 }
  0x40   :  { %p609_p2 = por %p608_p1, %p607_p0 }
  0x42   :  { %p611_p4 = por %p610_p3, %p609_p2 }
  0x44   :  { %p612_p5 = pnand %p611_p4, %p605_p13 }
  0x46   :  { %615 = shalt.err (!%p612_p5)  }
  0x47   :  { %s616_s24 = scalar_lea.vmem %s1055_s0, 16  ;;  %p621_p7 = scmp.lt.s32.totalorder %s1055_s0, %s1047_s21 }
  0x48   :  { %p617_p6 = scmp.ne.s32.totalorder %s1055_s0, %s616_s24  ;;  %p622_p8 = scmp.lt.s32.totalorder %s1073_s12, %s616_s24 }
  0x4a   :  { %p623_p9 = por %p622_p8, %p621_p7 }
  0x4c   :  { %p624_p10 = pnand %p623_p9, %p617_p6 }
  0x4e   :  { %627 = shalt.err (!%p624_p10)  }
  0x4f   :  { %60 = dma.hbm_to_vmem [thread:$0]  %s47_s25, 16, %s1055_s0, [#allocation3 + $0x2] }
  0x50   :  { %s64_s4 = scalar_lea.hbm %s1321_s1, %s485_s26  ;;  %s1002_s5 = smov [#allocation2 + $0x3]  }
  0x51   :  { %s74_s6 = sshll.u32 %s1002_s5, 4  ;;  %s1110_s7 = sld [smem:[#allocation5 + $0x4]]  ;;  %s75_s6 = int_to_ptr.vmem [resolvable:$true] %s74_s6 }
  0x52   :  { %s628_s9 = scalar_lea.hbm %s64_s4, 16  ;;  %p631_p12 = scmp.lt.u32.totalorder %s64_s4, %s1321_s1 }
  0x53   :  { %p629_p11 = scmp.ne.s32.totalorder %s64_s4, %s628_s9  ;;  %p632_p13 = scmp.lt.u32.totalorder %s1064_s8, %s628_s9 }
  0x54   :  { %p634_p1 = scmp.lt.u32.totalorder %s628_s9, %s64_s4 }
  0x55   :  { %p633_p0 = por %p632_p13, %p631_p12 }
  0x57   :  { %p635_p2 = por %p634_p1, %p633_p0 }
  0x59   :  { %p636_p3 = pnand %p635_p2, %p629_p11 }
  0x5b   :  { %639 = shalt.err (!%p636_p3)  }
  0x5c   :  { %s640_s0 = scalar_lea.vmem %s75_s6, 16  ;;  %p645_p5 = scmp.lt.s32.totalorder %s75_s6, %s1047_s21 }
  0x5d   :  { %p641_p4 = scmp.ne.s32.totalorder %s75_s6, %s640_s0  ;;  %p646_p6 = scmp.lt.s32.totalorder %s1073_s12, %s640_s0 }
  0x5f   :  { %p647_p7 = por %p646_p6, %p645_p5 }
  0x61   :  { %p648_p8 = pnand %p647_p7, %p641_p4 }
  0x63   :  { %651 = shalt.err (!%p648_p8)  }
  0x64   :  { %77 = dma.hbm_to_vmem [thread:$0]  %s64_s4, 16, %s75_s6, [#allocation3 + $0x3] }
  0x65   :  { %s1003_s13 = smov [#allocation2 + $0x4]   ;;  %s1118_s15 = sld [smem:[#allocation5 + $0x5]] }
  0x66   :  { %s91_s14 = sshll.u32 %s1003_s13, 4  ;;  %s1004_s16 = smov [#allocation2 + $0x5]   ;;  %s92_s14 = int_to_ptr.vmem [resolvable:$true] %s91_s14 }
  0x67   :  { %s108_s17 = sshll.u32 %s1004_s16, 4  ;;  %s1120_s18 = sld [smem:[#allocation5 + $0x6]]  ;;  %s1123_s17 = int_to_ptr.vmem [resolvable:$true] %s108_s17 }
  0x68   :  { %s487_s19 = sshll.u32 %s1110_s7, 4 }
  0x69   :  { %s81_s23 = scalar_lea.hbm %s1321_s1, %s487_s19 }
  0x6a   :  { %s652_s25 = scalar_lea.hbm %s81_s23, 16  ;;  %p655_p10 = scmp.lt.u32.totalorder %s81_s23, %s1321_s1 }
  0x6b   :  { %p653_p9 = scmp.ne.s32.totalorder %s81_s23, %s652_s25  ;;  %p656_p11 = scmp.lt.u32.totalorder %s1064_s8, %s652_s25 }
  0x6c   :  { %p658_p13 = scmp.lt.u32.totalorder %s652_s25, %s81_s23 }
  0x6d   :  { %p657_p12 = por %p656_p11, %p655_p10 }
  0x6f   :  { %p659_p0 = por %p658_p13, %p657_p12 }
  0x71   :  { %p660_p1 = pnand %p659_p0, %p653_p9 }
  0x73   :  { %663 = shalt.err (!%p660_p1)  }
  0x74   :  { %s664_s29 = scalar_lea.vmem %s92_s14, 16  ;;  %p669_p3 = scmp.lt.s32.totalorder %s92_s14, %s1047_s21 }
  0x75   :  { %p665_p2 = scmp.ne.s32.totalorder %s92_s14, %s664_s29  ;;  %p670_p4 = scmp.lt.s32.totalorder %s1073_s12, %s664_s29 }
  0x77   :  { %p671_p5 = por %p670_p4, %p669_p3 }
  0x79   :  { %p672_p6 = pnand %p671_p5, %p665_p2 }
  0x7b   :  { %675 = shalt.err (!%p672_p6)  }
  0x7c   :  { %94 = dma.hbm_to_vmem [thread:$0]  %s81_s23, 16, %s92_s14, [#allocation3 + $0x4] }
  0x7d   :  { %s489_s30 = sshll.u32 %s1118_s15, 4  ;;  %s1005_s24 = smov [#allocation2 + $0x6]  }
  0x7e   :  { %s125_s27 = sshll.u32 %s1005_s24, 4  ;;  %s98_s5 = scalar_lea.hbm %s1321_s1, %s489_s30  ;;  %s1138_s27 = int_to_ptr.vmem [resolvable:$true] %s125_s27 }
  0x7f   :  { %s676_s6 = scalar_lea.hbm %s98_s5, 16  ;;  %p679_p8 = scmp.lt.u32.totalorder %s98_s5, %s1321_s1 }
  0x80   :  { %p677_p7 = scmp.ne.s32.totalorder %s98_s5, %s676_s6  ;;  %p680_p9 = scmp.lt.u32.totalorder %s1064_s8, %s676_s6 }
  0x81   :  { %p682_p11 = scmp.lt.u32.totalorder %s676_s6, %s98_s5 }
  0x82   :  { %p681_p10 = por %p680_p9, %p679_p8 }
  0x84   :  { %p683_p12 = por %p682_p11, %p681_p10 }
  0x86   :  { %p684_p13 = pnand %p683_p12, %p677_p7 }
  0x88   :  { %687 = shalt.err (!%p684_p13)  }
  0x89   :  { %s688_s10 = scalar_lea.vmem %s1123_s17, 16  ;;  %p693_p1 = scmp.lt.s32.totalorder %s1123_s17, %s1047_s21 }
  0x8a   :  { %p689_p0 = scmp.ne.s32.totalorder %s1123_s17, %s688_s10  ;;  %p694_p2 = scmp.lt.s32.totalorder %s1073_s12, %s688_s10 }
  0x8c   :  { %p695_p3 = por %p694_p2, %p693_p1 }
  0x8e   :  { %p696_p4 = pnand %p695_p3, %p689_p0 }
  0x90   :  { %699 = shalt.err (!%p696_p4)  }
  0x91   :  { %111 = dma.hbm_to_vmem [thread:$0]  %s98_s5, 16, %s1123_s17, [#allocation3 + $0x5] }
  0x92   :  { %s491_s11 = sshll.u32 %s1120_s18, 4  ;;  %s1151_s0 = sld [smem:[#allocation5 + $0x7]] }
  0x93   :  { %s115_s15 = scalar_lea.hbm %s1321_s1, %s491_s11 }
  0x94   :  { %s700_s16 = scalar_lea.hbm %s115_s15, 16  ;;  %p703_p6 = scmp.lt.u32.totalorder %s115_s15, %s1321_s1 }
  0x95   :  { %p701_p5 = scmp.ne.s32.totalorder %s115_s15, %s700_s16  ;;  %p704_p7 = scmp.lt.u32.totalorder %s1064_s8, %s700_s16 }
  0x96   :  { %p706_p9 = scmp.lt.u32.totalorder %s700_s16, %s115_s15 }
  0x97   :  { %p705_p8 = por %p704_p7, %p703_p6 }
  0x99   :  { %p707_p10 = por %p706_p9, %p705_p8 }
  0x9b   :  { %p708_p11 = pnand %p707_p10, %p701_p5 }
  0x9d   :  { %711 = shalt.err (!%p708_p11)  }
  0x9e   :  { %s712_s17 = scalar_lea.vmem %s1138_s27, 16  ;;  %p717_p13 = scmp.lt.s32.totalorder %s1138_s27, %s1047_s21 }
  0x9f   :  { %p713_p12 = scmp.ne.s32.totalorder %s1138_s27, %s712_s17  ;;  %p718_p0 = scmp.lt.s32.totalorder %s1073_s12, %s712_s17 }
  0xa1   :  { %p719_p1 = por %p718_p0, %p717_p13 }
  0xa3   :  { %p720_p2 = pnand %p719_p1, %p713_p12 }
  0xa5   :  { %723 = shalt.err (!%p720_p2)  }
  0xa6   :  { %128 = dma.hbm_to_vmem [thread:$0]  %s115_s15, 16, %s1138_s27, [#allocation3 + $0x6] }
  0xa7   :  { %s1006_s18 = smov [#allocation2 + $0x7]   ;;  %s1166_s23 = sld [smem:[#allocation5 + $0x8]] }
  0xa8   :  { %s142_s22 = sshll.u32 %s1006_s18, 4  ;;  %s1007_s25 = smov [#allocation2 + $0x8]   ;;  %s143_s22 = int_to_ptr.vmem [resolvable:$true] %s142_s22 }
  0xa9   :  { %s159_s26 = sshll.u32 %s1007_s25, 4  ;;  %s1168_s28 = sld [smem:[#allocation5 + $0x9]]  ;;  %s1171_s26 = int_to_ptr.vmem [resolvable:$true] %s159_s26 }
  0xaa   :  { %s493_s29 = sshll.u32 %s1151_s0, 4 }
  0xab   :  { %s132_s3 = scalar_lea.hbm %s1321_s1, %s493_s29 }
  0xac   :  { %s724_s4 = scalar_lea.hbm %s132_s3, 16  ;;  %p727_p4 = scmp.lt.u32.totalorder %s132_s3, %s1321_s1 }
  0xad   :  { %p725_p3 = scmp.ne.s32.totalorder %s132_s3, %s724_s4  ;;  %p728_p5 = scmp.lt.u32.totalorder %s1064_s8, %s724_s4 }
  0xae   :  { %p730_p7 = scmp.lt.u32.totalorder %s724_s4, %s132_s3 }
  0xaf   :  { %p729_p6 = por %p728_p5, %p727_p4 }
  0xb1   :  { %p731_p8 = por %p730_p7, %p729_p6 }
  0xb3   :  { %p732_p9 = pnand %p731_p8, %p725_p3 }
  0xb5   :  { %735 = shalt.err (!%p732_p9)  }
  0xb6   :  { %s736_s6 = scalar_lea.vmem %s143_s22, 16  ;;  %p741_p11 = scmp.lt.s32.totalorder %s143_s22, %s1047_s21 }
  0xb7   :  { %p737_p10 = scmp.ne.s32.totalorder %s143_s22, %s736_s6  ;;  %p742_p12 = scmp.lt.s32.totalorder %s1073_s12, %s736_s6 }
  0xb9   :  { %p743_p13 = por %p742_p12, %p741_p11 }
  0xbb   :  { %p744_p0 = pnand %p743_p13, %p737_p10 }
  0xbd   :  { %747 = shalt.err (!%p744_p0)  }
  0xbe   :  { %145 = dma.hbm_to_vmem [thread:$0]  %s132_s3, 16, %s143_s22, [#allocation3 + $0x7] }
  0xbf   :  { %s495_s7 = sshll.u32 %s1166_s23, 4  ;;  %s1008_s9 = smov [#allocation2 + $0x9]  }
  0xc0   :  { %s176_s10 = sshll.u32 %s1008_s9, 4  ;;  %s149_s13 = scalar_lea.hbm %s1321_s1, %s495_s7  ;;  %s1186_s10 = int_to_ptr.vmem [resolvable:$true] %s176_s10 }
  0xc1   :  { %s748_s14 = scalar_lea.hbm %s149_s13, 16  ;;  %p751_p2 = scmp.lt.u32.totalorder %s149_s13, %s1321_s1 }
  0xc2   :  { %p749_p1 = scmp.ne.s32.totalorder %s149_s13, %s748_s14  ;;  %p752_p3 = scmp.lt.u32.totalorder %s1064_s8, %s748_s14 }
  0xc3   :  { %p754_p5 = scmp.lt.u32.totalorder %s748_s14, %s149_s13 }
  0xc4   :  { %p753_p4 = por %p752_p3, %p751_p2 }
  0xc6   :  { %p755_p6 = por %p754_p5, %p753_p4 }
  0xc8   :  { %p756_p7 = pnand %p755_p6, %p749_p1 }
  0xca   :  { %759 = shalt.err (!%p756_p7)  }
  0xcb   :  { %s760_s19 = scalar_lea.vmem %s1171_s26, 16  ;;  %p765_p9 = scmp.lt.s32.totalorder %s1171_s26, %s1047_s21 }
  0xcc   :  { %p761_p8 = scmp.ne.s32.totalorder %s1171_s26, %s760_s19  ;;  %p766_p10 = scmp.lt.s32.totalorder %s1073_s12, %s760_s19 }
  0xce   :  { %p767_p11 = por %p766_p10, %p765_p9 }
  0xd0   :  { %p768_p12 = pnand %p767_p11, %p761_p8 }
  0xd2   :  { %771 = shalt.err (!%p768_p12)  }
  0xd3   :  { %162 = dma.hbm_to_vmem [thread:$0]  %s149_s13, 16, %s1171_s26, [#allocation3 + $0x8] }
  0xd4   :  { %s497_s20 = sshll.u32 %s1168_s28, 4  ;;  %s1199_s17 = sld [smem:[#allocation5 + $0xa]] }
  0xd5   :  { %s166_s23 = scalar_lea.hbm %s1321_s1, %s497_s20 }
  0xd6   :  { %s772_s25 = scalar_lea.hbm %s166_s23, 16  ;;  %p775_p0 = scmp.lt.u32.totalorder %s166_s23, %s1321_s1 }
  0xd7   :  { %p773_p13 = scmp.ne.s32.totalorder %s166_s23, %s772_s25  ;;  %p776_p1 = scmp.lt.u32.totalorder %s1064_s8, %s772_s25 }
  0xd8   :  { %p778_p3 = scmp.lt.u32.totalorder %s772_s25, %s166_s23 }
  0xd9   :  { %p777_p2 = por %p776_p1, %p775_p0 }
  0xdb   :  { %p779_p4 = por %p778_p3, %p777_p2 }
  0xdd   :  { %p780_p5 = pnand %p779_p4, %p773_p13 }
  0xdf   :  { %783 = shalt.err (!%p780_p5)  }
  0xe0   :  { %s784_s26 = scalar_lea.vmem %s1186_s10, 16  ;;  %p789_p7 = scmp.lt.s32.totalorder %s1186_s10, %s1047_s21 }
  0xe1   :  { %p785_p6 = scmp.ne.s32.totalorder %s1186_s10, %s784_s26  ;;  %p790_p8 = scmp.lt.s32.totalorder %s1073_s12, %s784_s26 }
  0xe3   :  { %p791_p9 = por %p790_p8, %p789_p7 }
  0xe5   :  { %p792_p10 = pnand %p791_p9, %p785_p6 }
  0xe7   :  { %795 = shalt.err (!%p792_p10)  }
  0xe8   :  { %179 = dma.hbm_to_vmem [thread:$0]  %s166_s23, 16, %s1186_s10, [#allocation3 + $0x9] }
  0xe9   :  { %s1009_s28 = smov [#allocation2 + $0xa]   ;;  %s1214_s3 = sld [smem:[#allocation5 + $0xb]] }
  0xea   :  { %s193_s24 = sshll.u32 %s1009_s28, 4  ;;  %s1010_s4 = smov [#allocation2 + $0xb]   ;;  %s194_s24 = int_to_ptr.vmem [resolvable:$true] %s193_s24 }
  0xeb   :  { %s210_s5 = sshll.u32 %s1010_s4, 4  ;;  %s1216_s27 = sld [smem:[#allocation5 + $0xc]]  ;;  %s1219_s5 = int_to_ptr.vmem [resolvable:$true] %s210_s5 }
  0xec   :  { %s499_s6 = sshll.u32 %s1199_s17, 4 }
  0xed   :  { %s183_s11 = scalar_lea.hbm %s1321_s1, %s499_s6 }
  0xee   :  { %s796_s0 = scalar_lea.hbm %s183_s11, 16  ;;  %p799_p12 = scmp.lt.u32.totalorder %s183_s11, %s1321_s1 }
  0xef   :  { %p797_p11 = scmp.ne.s32.totalorder %s183_s11, %s796_s0  ;;  %p800_p13 = scmp.lt.u32.totalorder %s1064_s8, %s796_s0 }
  0xf0   :  { %p802_p1 = scmp.lt.u32.totalorder %s796_s0, %s183_s11 }
  0xf1   :  { %p801_p0 = por %p800_p13, %p799_p12 }
  0xf3   :  { %p803_p2 = por %p802_p1, %p801_p0 }
  0xf5   :  { %p804_p3 = pnand %p803_p2, %p797_p11 }
  0xf7   :  { %807 = shalt.err (!%p804_p3)  }
  0xf8   :  { %s808_s14 = scalar_lea.vmem %s194_s24, 16  ;;  %p813_p5 = scmp.lt.s32.totalorder %s194_s24, %s1047_s21 }
  0xf9   :  { %p809_p4 = scmp.ne.s32.totalorder %s194_s24, %s808_s14  ;;  %p814_p6 = scmp.lt.s32.totalorder %s1073_s12, %s808_s14 }
  0xfb   :  { %p815_p7 = por %p814_p6, %p813_p5 }
  0xfd   :  { %p816_p8 = pnand %p815_p7, %p809_p4 }
  0xff   :  { %819 = shalt.err (!%p816_p8)  }
 0x100   :  { %196 = dma.hbm_to_vmem [thread:$0]  %s183_s11, 16, %s194_s24, [#allocation3 + $0xa] }
 0x101   :  { %s501_s15 = sshll.u32 %s1214_s3, 4  ;;  %s1011_s16 = smov [#allocation2 + $0xc]  }
 0x102   :  { %s227_s19 = sshll.u32 %s1011_s16, 4  ;;  %s200_s18 = scalar_lea.hbm %s1321_s1, %s501_s15  ;;  %s1234_s19 = int_to_ptr.vmem [resolvable:$true] %s227_s19 }
 0x103   :  { %s820_s22 = scalar_lea.hbm %s200_s18, 16  ;;  %p823_p10 = scmp.lt.u32.totalorder %s200_s18, %s1321_s1 }
 0x104   :  { %p821_p9 = scmp.ne.s32.totalorder %s200_s18, %s820_s22  ;;  %p824_p11 = scmp.lt.u32.totalorder %s1064_s8, %s820_s22 }
 0x105   :  { %p826_p13 = scmp.lt.u32.totalorder %s820_s22, %s200_s18 }
 0x106   :  { %p825_p12 = por %p824_p11, %p823_p10 }
 0x108   :  { %p827_p0 = por %p826_p13, %p825_p12 }
 0x10a   :  { %p828_p1 = pnand %p827_p0, %p821_p9 }
 0x10c   :  { %831 = shalt.err (!%p828_p1)  }
 0x10d   :  { %s832_s29 = scalar_lea.vmem %s1219_s5, 16  ;;  %p837_p3 = scmp.lt.s32.totalorder %s1219_s5, %s1047_s21 }
 0x10e   :  { %p833_p2 = scmp.ne.s32.totalorder %s1219_s5, %s832_s29  ;;  %p838_p4 = scmp.lt.s32.totalorder %s1073_s12, %s832_s29 }
 0x110   :  { %p839_p5 = por %p838_p4, %p837_p3 }
 0x112   :  { %p840_p6 = pnand %p839_p5, %p833_p2 }
 0x114   :  { %843 = shalt.err (!%p840_p6)  }
 0x115   :  { %213 = dma.hbm_to_vmem [thread:$0]  %s200_s18, 16, %s1219_s5, [#allocation3 + $0xb] }
 0x116   :  { %s503_s30 = sshll.u32 %s1216_s27, 4  ;;  %s1247_s26 = sld [smem:[#allocation5 + $0xd]] }
 0x117   :  { %s217_s3 = scalar_lea.hbm %s1321_s1, %s503_s30 }
 0x118   :  { %s844_s4 = scalar_lea.hbm %s217_s3, 16  ;;  %p847_p8 = scmp.lt.u32.totalorder %s217_s3, %s1321_s1 }
 0x119   :  { %p845_p7 = scmp.ne.s32.totalorder %s217_s3, %s844_s4  ;;  %p848_p9 = scmp.lt.u32.totalorder %s1064_s8, %s844_s4 }
 0x11a   :  { %p850_p11 = scmp.lt.u32.totalorder %s844_s4, %s217_s3 }
 0x11b   :  { %p849_p10 = por %p848_p9, %p847_p8 }
 0x11d   :  { %p851_p12 = por %p850_p11, %p849_p10 }
 0x11f   :  { %p852_p13 = pnand %p851_p12, %p845_p7 }
 0x121   :  { %855 = shalt.err (!%p852_p13)  }
 0x122   :  { %s856_s5 = scalar_lea.vmem %s1234_s19, 16  ;;  %p861_p1 = scmp.lt.s32.totalorder %s1234_s19, %s1047_s21 }
 0x123   :  { %p857_p0 = scmp.ne.s32.totalorder %s1234_s19, %s856_s5  ;;  %p862_p2 = scmp.lt.s32.totalorder %s1073_s12, %s856_s5 }
 0x125   :  { %p863_p3 = por %p862_p2, %p861_p1 }
 0x127   :  { %p864_p4 = pnand %p863_p3, %p857_p0 }
 0x129   :  { %867 = shalt.err (!%p864_p4)  }
 0x12a   :  { %230 = dma.hbm_to_vmem [thread:$0]  %s217_s3, 16, %s1234_s19, [#allocation3 + $0xc] }
 0x12b   :  { %s1012_s27 = smov [#allocation2 + $0xd]   ;;  %s1262_s11 = sld [smem:[#allocation5 + $0xe]] }
 0x12c   :  { %s244_s9 = sshll.u32 %s1012_s27, 4  ;;  %s1013_s0 = smov [#allocation2 + $0xe]   ;;  %s245_s9 = int_to_ptr.vmem [resolvable:$true] %s244_s9 }
 0x12d   :  { %s261_s13 = sshll.u32 %s1013_s0, 4  ;;  %s1264_s10 = sld [smem:[#allocation5 + $0xf]]  ;;  %s1267_s13 = int_to_ptr.vmem [resolvable:$true] %s261_s13 }
 0x12e   :  { %s505_s14 = sshll.u32 %s1247_s26, 4 }
 0x12f   :  { %s234_s20 = scalar_lea.hbm %s1321_s1, %s505_s14 }
 0x130   :  { %s868_s17 = scalar_lea.hbm %s234_s20, 16  ;;  %p871_p6 = scmp.lt.u32.totalorder %s234_s20, %s1321_s1 }
 0x131   :  { %p869_p5 = scmp.ne.s32.totalorder %s234_s20, %s868_s17  ;;  %p872_p7 = scmp.lt.u32.totalorder %s1064_s8, %s868_s17 }
 0x132   :  { %p874_p9 = scmp.lt.u32.totalorder %s868_s17, %s234_s20 }
 0x133   :  { %p873_p8 = por %p872_p7, %p871_p6 }
 0x135   :  { %p875_p10 = por %p874_p9, %p873_p8 }
 0x137   :  { %p876_p11 = pnand %p875_p10, %p869_p5 }
 0x139   :  { %879 = shalt.err (!%p876_p11)  }
 0x13a   :  { %s880_s22 = scalar_lea.vmem %s245_s9, 16  ;;  %p885_p13 = scmp.lt.s32.totalorder %s245_s9, %s1047_s21 }
 0x13b   :  { %p881_p12 = scmp.ne.s32.totalorder %s245_s9, %s880_s22  ;;  %p886_p0 = scmp.lt.s32.totalorder %s1073_s12, %s880_s22 }
 0x13d   :  { %p887_p1 = por %p886_p0, %p885_p13 }
 0x13f   :  { %p888_p2 = pnand %p887_p1, %p881_p12 }
 0x141   :  { %891 = shalt.err (!%p888_p2)  }
 0x142   :  { %247 = dma.hbm_to_vmem [thread:$0]  %s234_s20, 16, %s245_s9, [#allocation3 + $0xd] }
 0x143   :  { %s507_s23 = sshll.u32 %s1262_s11, 4  ;;  %s1014_s25 = smov [#allocation2 + $0xf]  }
 0x144   :  { %s278_s29 = sshll.u32 %s1014_s25, 4  ;;  %s251_s28 = scalar_lea.hbm %s1321_s1, %s507_s23  ;;  %s1282_s29 = int_to_ptr.vmem [resolvable:$true] %s278_s29 }
 0x145   :  { %s892_s24 = scalar_lea.hbm %s251_s28, 16  ;;  %p895_p4 = scmp.lt.u32.totalorder %s251_s28, %s1321_s1 }
 0x146   :  { %p893_p3 = scmp.ne.s32.totalorder %s251_s28, %s892_s24  ;;  %p896_p5 = scmp.lt.u32.totalorder %s1064_s8, %s892_s24 }
 0x147   :  { %p898_p7 = scmp.lt.u32.totalorder %s892_s24, %s251_s28 }
 0x148   :  { %p897_p6 = por %p896_p5, %p895_p4 }
 0x14a   :  { %p899_p8 = por %p898_p7, %p897_p6 }
 0x14c   :  { %p900_p9 = pnand %p899_p8, %p893_p3 }
 0x14e   :  { %903 = shalt.err (!%p900_p9)  }
 0x14f   :  { %s904_s6 = scalar_lea.vmem %s1267_s13, 16  ;;  %p909_p11 = scmp.lt.s32.totalorder %s1267_s13, %s1047_s21 }
 0x150   :  { %p905_p10 = scmp.ne.s32.totalorder %s1267_s13, %s904_s6  ;;  %p910_p12 = scmp.lt.s32.totalorder %s1073_s12, %s904_s6 }
 0x152   :  { %p911_p13 = por %p910_p12, %p909_p11 }
 0x154   :  { %p912_p0 = pnand %p911_p13, %p905_p10 }
 0x156   :  { %915 = shalt.err (!%p912_p0)  }
 0x157   :  { %264 = dma.hbm_to_vmem [thread:$0]  %s251_s28, 16, %s1267_s13, [#allocation3 + $0xe] }
 0x158   :  { %s509_s7 = sshll.u32 %s1264_s10, 4 }
 0x159   :  { %s268_s9 = scalar_lea.hbm %s1321_s1, %s509_s7 }
 0x15a   :  { %s916_s11 = scalar_lea.hbm %s268_s9, 16  ;;  %p919_p2 = scmp.lt.u32.totalorder %s268_s9, %s1321_s1 }
 0x15b   :  { %p917_p1 = scmp.ne.s32.totalorder %s268_s9, %s916_s11  ;;  %p920_p3 = scmp.lt.u32.totalorder %s1064_s8, %s916_s11 }
 0x15c   :  { %p922_p5 = scmp.lt.u32.totalorder %s916_s11, %s268_s9 }
 0x15d   :  { %p921_p4 = por %p920_p3, %p919_p2 }
 0x15f   :  { %p923_p6 = por %p922_p5, %p921_p4 }
 0x161   :  { %p924_p7 = pnand %p923_p6, %p917_p1 }
 0x163   :  { %927 = shalt.err (!%p924_p7)  }
 0x164   :  { %s928_s13 = scalar_lea.vmem %s1282_s29, 16  ;;  %p933_p9 = scmp.lt.s32.totalorder %s1282_s29, %s1047_s21 }
 0x165   :  { %p929_p8 = scmp.ne.s32.totalorder %s1282_s29, %s928_s13  ;;  %p934_p10 = scmp.lt.s32.totalorder %s1073_s12, %s928_s13 }
 0x167   :  { %p935_p11 = por %p934_p10, %p933_p9 }
 0x169   :  { %p936_p12 = pnand %p935_p11, %p929_p8 }
 0x16b   :  { %939 = shalt.err (!%p936_p12)  }
 0x16c   :  { %281 = dma.hbm_to_vmem [thread:$0]  %s268_s9, 16, %s1282_s29, [#allocation3 + $0xf] }
 0x16d   :  { %964 = dma.done.wait [#allocation3], 16 }
 0x16e   :  { %965 = vsyncadd [#allocation3], 4294967280 }
 0x16f   :  { %966 = dma.done.wait [#allocation3 + $0x1], 16 }
 0x170   :  { %967 = vsyncadd [#allocation3 + $0x1], 4294967280 }
 0x171   :  { %968 = dma.done.wait [#allocation3 + $0x2], 16 }
 0x172   :  { %969 = vsyncadd [#allocation3 + $0x2], 4294967280 }
 0x173   :  { %970 = dma.done.wait [#allocation3 + $0x3], 16 }
 0x174   :  { %971 = vsyncadd [#allocation3 + $0x3], 4294967280 }
 0x175   :  { %972 = dma.done.wait [#allocation3 + $0x4], 16 }
 0x176   :  { %973 = vsyncadd [#allocation3 + $0x4], 4294967280 }
 0x177   :  { %974 = dma.done.wait [#allocation3 + $0x5], 16 }
 0x178   :  { %975 = vsyncadd [#allocation3 + $0x5], 4294967280 }
 0x179   :  { %976 = dma.done.wait [#allocation3 + $0x6], 16 }
 0x17a   :  { %977 = vsyncadd [#allocation3 + $0x6], 4294967280 }
 0x17b   :  { %978 = dma.done.wait [#allocation3 + $0x7], 16 }
 0x17c   :  { %979 = vsyncadd [#allocation3 + $0x7], 4294967280 }
 0x17d   :  { %980 = dma.done.wait [#allocation3 + $0x8], 16 }
 0x17e   :  { %981 = vsyncadd [#allocation3 + $0x8], 4294967280 }
 0x17f   :  { %982 = dma.done.wait [#allocation3 + $0x9], 16 }
 0x180   :  { %983 = vsyncadd [#allocation3 + $0x9], 4294967280 }
 0x181   :  { %984 = dma.done.wait [#allocation3 + $0xa], 16 }
 0x182   :  { %985 = vsyncadd [#allocation3 + $0xa], 4294967280 }
 0x183   :  { %986 = dma.done.wait [#allocation3 + $0xb], 16 }
 0x184   :  { %987 = vsyncadd [#allocation3 + $0xb], 4294967280 }
 0x185   :  { %988 = dma.done.wait [#allocation3 + $0xc], 16 }
 0x186   :  { %989 = vsyncadd [#allocation3 + $0xc], 4294967280 }
 0x187   :  { %990 = dma.done.wait [#allocation3 + $0xd], 16 }
 0x188   :  { %991 = vsyncadd [#allocation3 + $0xd], 4294967280 }
 0x189   :  { %992 = dma.done.wait [#allocation3 + $0xe], 16 }
 0x18a   :  { %993 = vsyncadd [#allocation3 + $0xe], 4294967280 }
 0x18b   :  { %994 = dma.done.wait [#allocation3 + $0xf], 16 }
 0x18c   :  { %995 = vsyncadd [#allocation3 + $0xf], 4294967280  ;;  %s1015_s1 = smov [#allocation6]   ;;  %vm317_vm0 = vcmask 261120   ;;  %v315_v0 = vld [vmem:[#allocation2] sm:$0xff]  ;;  %v316_v1 = vld [vmem:[#allocation2 + $0x8] sm:$0xff] }
 0x18d   :  { %s325_s21 = sshll.u32 %s1015_s1, 4  ;;  %318 = vst.msk [vmem:[#allocation6] sm:$0xff] %vm317_vm0, %v315_v0  ;;  %319 = vst.msk [vmem:[#allocation6 + $0x8] sm:$0xff] %vm317_vm0, %v316_v1  ;;  %s326_s21 = int_to_ptr.vmem [resolvable:$true] %s325_s21 }
 0x18e   :  { %s940_s8 = scalar_lea.vmem %s326_s21, 256  ;;  %p945_p0 = scmp.lt.s32.totalorder %s326_s21, %s326_s21 }
 0x18f   :  { %p941_p13 = scmp.ne.s32.totalorder %s326_s21, %s940_s8  ;;  %p946_p1 = scmp.lt.s32.totalorder %s940_s8, %s940_s8 }
 0x191   :  { %p947_p2 = por %p946_p1, %p945_p0 }
 0x193   :  { %p948_p3 = pnand %p947_p2, %p941_p13 }
 0x195   :  { %951 = shalt.err (!%p948_p3)
}
 0x196   :  { %s952_s15 = scalar_lea.hbm %s1322_s2, 256 }
 0x197   :  { %p953_p4 = scmp.ne.s32.totalorder %s1322_s2, %s952_s15  ;;  %p956_p5 = scmp.lt.u32.totalorder %s952_s15, %s1322_s2 }
 0x199   :  { %p958_p6 = pnand %p956_p5, %p953_p4 }
 0x19b   :  { %961 = shalt.err (!%p958_p6)
}
 0x19c   :  { %s1016_s19 = smov 128   ;;  %s1017_s22 = smov 8  }
 0x19d   :  { %331 = dma.vmem_to_hbm [thread:$0]  %s326_s21, 256, %s1322_s2, [#allocation7], %s1016_s19, %s1016_s19, %s1017_s22  }
 0x19e   :  { %996 = dma.done.wait [#allocation7], 256  }
 0x19f   :  { %997 = vsyncadd [#allocation7], 4294967040 }
 0x1a0   :  { %335 = vsyncpa [#allocation7], 1 }
 0x1a1   :  { %336 = vsyncmov [#allocation3] }
 0x1a4   :  { %s337_s29 = vpop.sfrf %336 }
 0x1a5   :  { %p510_p7 = scmp.ne.s32.totalorder %s337_s29, 0 }
 0x1a7   :  { %341 = shalt.err (%p510_p7)  }
 0x1a8   :  { %343 = vsyncmov [#allocation3 + $0x1] }
 0x1ab   :  { %s344_s30 = vpop.sfrf %343 }
 0x1ac   :  { %p511_p8 = scmp.ne.s32.totalorder %s344_s30, 0 }
 0x1ae   :  { %348 = shalt.err (%p511_p8)  }
 0x1af   :  { %350 = vsyncmov [#allocation3 + $0x2] }
 0x1b2   :  { %s351_s26 = vpop.sfrf %350 }
 0x1b3   :  { %p512_p9 = scmp.ne.s32.totalorder %s351_s26, 0 }
 0x1b5   :  { %355 = shalt.err (%p512_p9)  }
 0x1b6   :  { %357 = vsyncmov [#allocation3 + $0x3] }
 0x1b9   :  { %s358_s28 = vpop.sfrf %357 }
 0x1ba   :  { %p513_p10 = scmp.ne.s32.totalorder %s358_s28, 0 }
 0x1bc   :  { %362 = shalt.err (%p513_p10)  }
 0x1bd   :  { %364 = vsyncmov [#allocation3 + $0x4] }
 0x1c0   :  { %s365_s2 = vpop.sfrf %364 }
 0x1c1   :  { %p514_p11 = scmp.ne.s32.totalorder %s365_s2, 0 }
 0x1c3   :  { %369 = shalt.err (%p514_p11)  }
 0x1c4   :  { %371 = vsyncmov [#allocation3 + $0x5] }
 0x1c7   :  { %s372_s24 = vpop.sfrf %371 }
 0x1c8   :  { %p515_p12 = scmp.ne.s32.totalorder %s372_s24, 0 }
 0x1ca   :  { %376 = shalt.err (%p515_p12)  }
 0x1cb   :  { %378 = vsyncmov [#allocation3 + $0x6] }
 0x1ce   :  { %s379_s3 = vpop.sfrf %378 }
 0x1cf   :  { %p516_p13 = scmp.ne.s32.totalorder %s379_s3, 0 }
 0x1d1   :  { %383 = shalt.err (%p516_p13)  }
 0x1d2   :  { %385 = vsyncmov [#allocation3 + $0x7] }
 0x1d5   :  { %s386_s4 = vpop.sfrf %385 }
 0x1d6   :  { %p517_p0 = scmp.ne.s32.totalorder %s386_s4, 0 }
 0x1d8   :  { %390 = shalt.err (%p517_p0)  }
 0x1d9   :  { %392 = vsyncmov [#allocation3 + $0x8] }
 0x1dc   :  { %s393_s6 = vpop.sfrf %392 }
 0x1dd   :  { %p518_p1 = scmp.ne.s32.totalorder %s393_s6, 0 }
 0x1df   :  { %397 = shalt.err (%p518_p1)  }
 0x1e0   :  { %399 = vsyncmov [#allocation3 + $0x9] }
 0x1e3   :  { %s400_s7 = vpop.sfrf %399 }
 0x1e4   :  { %p519_p2 = scmp.ne.s32.totalorder %s400_s7, 0 }
 0x1e6   :  { %404 = shalt.err (%p519_p2)  }
 0x1e7   :  { %406 = vsyncmov [#allocation3 + $0xa] }
 0x1ea   :  { %s407_s5 = vpop.sfrf %406 }
 0x1eb   :  { %p520_p3 = scmp.ne.s32.totalorder %s407_s5, 0 }
 0x1ed   :  { %411 = shalt.err (%p520_p3)  }
 0x1ee   :  { %413 = vsyncmov [#allocation3 + $0xb] }
 0x1f1   :  { %s414_s27 = vpop.sfrf %413 }
 0x1f2   :  { %p521_p4 = scmp.ne.s32.totalorder %s414_s27, 0 }
 0x1f4   :  { %418 = shalt.err (%p521_p4)  }
 0x1f5   :  { %420 = vsyncmov [#allocation3 + $0xc] }
 0x1f8   :  { %s421_s9 = vpop.sfrf %420 }
 0x1f9   :  { %p522_p5 = scmp.ne.s32.totalorder %s421_s9, 0 }
 0x1fb   :  { %425 = shalt.err (%p522_p5)  }
 0x1fc   :  { %427 = vsyncmov [#allocation3 + $0xd] }
 0x1ff   :  { %s428_s11 = vpop.sfrf %427 }
 0x200   :  { %p523_p6 = scmp.ne.s32.totalorder %s428_s11, 0 }
 0x202   :  { %432 = shalt.err (%p523_p6)  }
 0x203   :  { %434 = vsyncmov [#allocation3 + $0xe] }
 0x206   :  { %s435_s0 = vpop.sfrf %434 }
 0x207   :  { %p524_p7 = scmp.ne.s32.totalorder %s435_s0, 0 }
 0x209   :  { %439 = shalt.err (%p524_p7)  }
 0x20a   :  { %441 = vsyncmov [#allocation3 + $0xf] }
 0x20d   :  { %s442_s14 = vpop.sfrf %441 }
 0x20e   :  { %p525_p8 = scmp.ne.s32.totalorder %s442_s14, 0 }
 0x210   :  { %446 = shalt.err (%p525_p8)  }

</bundles_post_ra>
